<compile_context>
chip_gen: v6e
topology: v6e:2x2x1
jax: 0.10.0
libtpu: 0.0.40
codegen_flags: <defaults>
</compile_context>

<pallas_src>
import functools

import jax
import jax.numpy as jnp
import numpy as np
from jax.experimental import pallas as pl
from jax.experimental.pallas import tpu as pltpu

BN_EPS = 1e-5


# ---------------------------------------------------------------------------
# Fused kernel: per-point MLP -> max-pool -> FC head, one batch block per step.
# ---------------------------------------------------------------------------
def _netlocald_kernel(x_ref,
                      w1, w2, w3, w4,
                      f1a, f1b, f1c, fw2, fw3, fw4r,
                      bias_ref,
                      o_ref, *, act_dt):
    bb, n, _ = x_ref.shape

    # Packed per-layer shifts (BN folded): one (8, 256) f32 tile, sliced here.
    b = bias_ref
    s1 = b[0:1, 0:64].astype(act_dt)
    s2 = b[1:2, 0:64].astype(act_dt)
    s3 = b[2:3, 0:128].astype(act_dt)
    s4 = b[3:4, 0:256].astype(act_dt)
    fs1 = b[4:5, 0:256].astype(act_dt)
    fs2 = b[5:6, 0:128].astype(act_dt)
    fs3 = b[6:7, 0:16].astype(act_dt)
    fb4 = b[7:8, 0:1]                                       # stays f32

    def mm(a, w_ref):  # bf16 MXU matmul, f32 accumulation
        return jnp.dot(a.astype(jnp.bfloat16), w_ref[...],
                       preferred_element_type=jnp.float32)

    def act(z, s):     # folded-BN shift + ReLU in the activation dtype
        return jnp.maximum(z.astype(act_dt) + s, 0.0)

    # conv1..conv4 (+ folded BN + ReLU).  conv1 is a K=8 (3 real + 5 zero
    # channels) MXU matmul streaming from the loaded input block; no lane
    # broadcasts, no transpose.
    x = x_ref[...].reshape(bb * n, 8)                       # (BB*N, 8) f32
    h1 = act(mm(x, w1), s1)                                 # (BB*N, 64)
    h2 = act(mm(h1, w2), s2)                                # (BB*N, 64)
    h3 = act(mm(h2, w3), s3)                                # (BB*N, 128)
    h4 = act(mm(h3, w4), s4)                                # (BB*N, 256)

    # MaxPool2d((crop_point_num, 1)) == max over the point axis, per element.
    f64 = jnp.max(h2.reshape(bb, n, 64), axis=1)            # (BB, 64)
    f128 = jnp.max(h3.reshape(bb, n, 128), axis=1)          # (BB, 128)
    f256 = jnp.max(h4.reshape(bb, n, 256), axis=1)          # (BB, 256)

    # fc1 on cat([f256, f128, f64]) without a lane-axis concatenate: fc1's
    # weight is pre-split into the three matching row segments.
    g = act(mm(f256, f1a) + mm(f128, f1b) + mm(f64, f1c), fs1)   # (BB, 256)
    g = act(mm(g, fw2), fs2)                                     # (BB, 128)
    g = act(mm(g, fw3), fs3)                                     # (BB, 16)
    # fc4 (16 -> 1) on the VPU: a lane reduction beats a near-empty MXU pass.
    o_ref[...] = (jnp.sum(g.astype(jnp.float32) * fw4r[...],
                          axis=-1, keepdims=True) + fb4)         # (BB, 1) f32


# ---------------------------------------------------------------------------
# Generation-aware sizing.
# ---------------------------------------------------------------------------
def _tpu_config():
    """Return (physical VMEM bytes, preferred activation dtype)."""
    vmem_cap = 128 * 1024 * 1024
    kind = ""
    try:
        kind = (getattr(jax.devices()[0], "device_kind", "") or "").lower()
    except Exception:
        pass
    try:
        info = pltpu.get_tpu_info()
        vmem_cap = int(getattr(info, "vmem_capacity_bytes", vmem_cap)
                       or vmem_cap)
    except Exception:
        pass
    # v5 has no bf16 VALU -> keep activations f32 there; v6e/v7x use bf16.
    act_dtype = jnp.float32 if "v5" in kind else jnp.bfloat16
    return vmem_cap, act_dtype


def _plan(B, N, act_bytes, vmem_cap):
    """Pick batch-block size bb and a scoped-VMEM limit with real accounting.

    Per batch element and grid step:
      * input block (N, 8) f32 is lane-padded to (N, 128): N*512 B, with two
        pipeline buffers plus the loaded vreg copy -> 3x,
      * live activations h1..h4 in act_bytes, lane-padded (128/128/128/256),
    plus a fixed allowance for double-buffered weights/biases/out + scratch.
    """
    n_pad = -(-N // 8) * 8
    in_blk = n_pad * 128 * 4
    acts = N * (128 + 128 + 128 + 256) * act_bytes
    per_elem = 3 * in_blk + acts
    fixed = 6 * 1024 * 1024
    # Scoped-VMEM target: 64 MiB on v5e/v6e (128 MiB physical), 32 MiB on v7x.
    target = min(vmem_cap // 2, 64 * 1024 * 1024)
    budget = max(target - fixed, 2 * 1024 * 1024)

    bb = max(8, (min(B, budget // per_elem) // 8) * 8)
    if B > 8:
        # Keep >= 2 grid steps so both v7x TensorCores get work; per-step
        # overhead (~0.35 us + tiny weight re-DMA) is negligible on v5e/v6e.
        half = ((-(-B // 2)) + 7) // 8 * 8
        bb = min(bb, max(8, half))
    bb = min(bb, -(-B // 8) * 8)

    vmem_limit = min(max(target, bb * per_elem + fixed),
                     max(int(vmem_cap * 0.9), 16 * 1024 * 1024))
    return bb, int(vmem_limit)


def _pack_bias_rows(rows):
    """Pack the 8 per-layer shift/bias vectors into one (8, 256) f32 array."""
    packed = jnp.zeros((8, 256), jnp.float32)
    for r, v in enumerate(rows):
        v = jnp.asarray(v, jnp.float32).reshape(-1)
        packed = packed.at[r, : v.shape[0]].set(v)
    return packed


# ---------------------------------------------------------------------------
# Wrapper.
# ---------------------------------------------------------------------------
def netlocald_forward(x_nchw, params, *, act_dtype=None):
    """x_nchw: (B, 1, crop_point_num, 3) float32 -> (B, 1) float32."""
    B, C, N, K = x_nchw.shape
    assert C == 1 and K == 3
    assert N % 8 == 0, ("crop_point_num must be a multiple of 8 so the "
                        "in-kernel reshapes are layout-preserving")

    vmem_cap, auto_act = _tpu_config()
    act_dt = auto_act if act_dtype is None else act_dtype
    act_bytes = jnp.dtype(act_dt).itemsize

    (w1, s1), (w2, s2), (w3, s3), (w4, s4) = params["point"]
    (fw1, fs1), (fw2, fs2), (fw3, fs3), (fw4, fb4) = params["head"]

    bf16 = jnp.bfloat16
    # bf16 weights for the MXU; conv1 weight zero-padded from 3 to 8 rows.
    w1p = jnp.zeros((8, 64), jnp.float32).at[:3, :].set(w1).astype(bf16)
    w2b, w3b, w4b = w2.astype(bf16), w3.astype(bf16), w4.astype(bf16)
    f1a = fw1[0:256, :].astype(bf16)        # multiplies f256
    f1b = fw1[256:384, :].astype(bf16)      # multiplies f128
    f1c = fw1[384:448, :].astype(bf16)      # multiplies f64
    fw2b, fw3b = fw2.astype(bf16), fw3.astype(bf16)
    fw4r = fw4.reshape(1, 16).astype(jnp.float32)   # fc4 as a VPU row
    biases = _pack_bias_rows([s1, s2, s3, s4, fs1, fs2, fs3, fb4])

    bb, vmem_limit = _plan(B, N, act_bytes, vmem_cap)
    b_pad = -(-B // bb) * bb
    x = x_nchw[:, 0, :, :]                                  # (B, N, 3)
    # Pad batch to a multiple of bb (padded rows are independent thanks to the
    # per-element max-pool and sliced off below) and channels 3 -> 8 (zeros,
    # matching the zero rows of w1p).
    x = jnp.pad(x, ((0, b_pad - B), (0, 0), (0, 5)))        # (b_pad, N, 8)

    _c = lambda i: (0, 0)  # constant index map for weights / biases
    kernel = functools.partial(_netlocald_kernel, act_dt=act_dt)

    out = pl.pallas_call(
        kernel,
        out_shape=jax.ShapeDtypeStruct((b_pad, 1), jnp.float32),
        grid=(b_pad // bb,),
        in_specs=[
            pl.BlockSpec((bb, N, 8), lambda i: (i, 0, 0)),
            pl.BlockSpec((8, 64), _c),        # conv1
            pl.BlockSpec((64, 64), _c),       # conv2
            pl.BlockSpec((64, 128), _c),      # conv3
            pl.BlockSpec((128, 256), _c),     # conv4
            pl.BlockSpec((256, 256), _c),     # fc1 (rows for f256)
            pl.BlockSpec((128, 256), _c),     # fc1 (rows for f128)
            pl.BlockSpec((64, 256), _c),      # fc1 (rows for f64)
            pl.BlockSpec((256, 128), _c),     # fc2
            pl.BlockSpec((128, 16), _c),      # fc3
            pl.BlockSpec((1, 16), _c),        # fc4 row (VPU)
            pl.BlockSpec((8, 256), _c),       # packed shifts/biases
        ],
        out_specs=pl.BlockSpec((bb, 1), lambda i: (i, 0)),
        compiler_params=pltpu.CompilerParams(
            dimension_semantics=("parallel",),
            vmem_limit_bytes=vmem_limit),
    )(x, w1p, w2b, w3b, w4b, f1a, f1b, f1c, fw2b, fw3b, fw4r, biases)
    return out[:B]


# ---------------------------------------------------------------------------
# Deterministic parameter construction (BN folded into weight scale + shift).
# ---------------------------------------------------------------------------
def _bn_folded_layer(key, cin, cout):
    k = jax.random.split(key, 6)
    w = 0.1 * jax.random.normal(k[0], (cin, cout), jnp.float32)
    b = 0.1 * jax.random.normal(k[1], (cout,), jnp.float32)
    gamma = 1.0 + 0.1 * jax.random.normal(k[2], (cout,), jnp.float32)
    beta = 0.1 * jax.random.normal(k[3], (cout,), jnp.float32)
    r_mean = 0.1 * jax.random.normal(k[4], (cout,), jnp.float32)
    r_var = 1.0 + 0.1 * jnp.abs(jax.random.normal(k[5], (cout,), jnp.float32))
    scale = gamma / jnp.sqrt(r_var + BN_EPS)
    w_eff = w * scale[None, :]
    shift = ((b - r_mean) * scale + beta)[None, :]           # (1, cout)
    return w_eff, shift


def init_params(key):
    ks = jax.random.split(key, 9)
    point = (
        _bn_folded_layer(ks[0], 3, 64),     # conv1 + bn1
        _bn_folded_layer(ks[1], 64, 64),    # conv2 + bn2
        _bn_folded_layer(ks[2], 64, 128),   # conv3 + bn3
        _bn_folded_layer(ks[3], 128, 256),  # conv4 + bn4
    )
    w4 = 0.1 * jax.random.normal(ks[7], (16, 1), jnp.float32)
    b4 = 0.1 * jax.random.normal(ks[8], (1, 1), jnp.float32)
    head = (
        _bn_folded_layer(ks[4], 448, 256),  # fc1 + bn_1
        _bn_folded_layer(ks[5], 256, 128),  # fc2 + bn_2
        _bn_folded_layer(ks[6], 128, 16),   # fc3 + bn_3
        (w4, b4),                           # fc4 (no BN)
    )
    return {"point": point, "head": head}


# ---------------------------------------------------------------------------
# Pure-JAX reference mirroring the kernel numerics (folded BN, bf16 matmul
# operands with f32 accumulation, activations in act_dtype, VPU fc4).
# ---------------------------------------------------------------------------
def ref_forward(x_nchw, params, *, act_dtype=jnp.bfloat16):
    (w1, s1), (w2, s2), (w3, s3), (w4, s4) = params["point"]
    (fw1, fs1), (fw2, fs2), (fw3, fs3), (fw4, fb4) = params["head"]
    bf16 = jnp.bfloat16

    def mm(a, w):
        return jnp.dot(a.astype(bf16), w.astype(bf16),
                       preferred_element_type=jnp.float32)

    def act(z, s):
        return jnp.maximum(z.astype(act_dtype) + s.astype(act_dtype), 0.0)

    x = x_nchw[:, 0, :, :]                                   # (B, N, 3)
    h1 = act(mm(x, w1), s1)
    h2 = act(mm(h1, w2), s2)
    h3 = act(mm(h2, w3), s3)
    h4 = act(mm(h3, w4), s4)
    f64 = jnp.max(h2, axis=1)
    f128 = jnp.max(h3, axis=1)
    f256 = jnp.max(h4, axis=1)
    g = act(mm(f256, fw1[0:256]) + mm(f128, fw1[256:384])
            + mm(f64, fw1[384:448]), fs1)
    g = act(mm(g, fw2), fs2)
    g = act(mm(g, fw3), fs3)
    return (jnp.sum(g.astype(jnp.float32) * fw4.reshape(1, 16),
                    axis=-1, keepdims=True) + fb4)


if __name__ == "__main__":
    B = 2
    CROP_POINT_NUM = 16

    key = jax.random.PRNGKey(0)
    k_param, k_x = jax.random.split(key)
    params = init_params(k_param)
    x = jax.random.normal(k_x, (B, 1, CROP_POINT_NUM, 3), jnp.float32)

    _, act_dt = _tpu_config()
    fwd = jax.jit(functools.partial(netlocald_forward, act_dtype=act_dt))
    out = jax.block_until_ready(fwd(x, params))

    ref = ref_forward(x, params, act_dtype=act_dt)
    assert out.shape == (B, 1), out.shape
    np.testing.assert_allclose(np.asarray(out), np.asarray(ref),
                               rtol=5e-3, atol=5e-3)
    print("KERNEL_OK")
</pallas_src>

<mosaic_0001>
module attributes {stable_mosaic.version = 11 : i64} {
  func.func @_netlocald_kernel(%arg0: i32, %arg1: memref<8x16x8xf32, #tpu.memory_space<vmem>>, %arg2: memref<8x64xbf16, #tpu.memory_space<vmem>>, %arg3: memref<64x64xbf16, #tpu.memory_space<vmem>>, %arg4: memref<64x128xbf16, #tpu.memory_space<vmem>>, %arg5: memref<128x256xbf16, #tpu.memory_space<vmem>>, %arg6: memref<256x256xbf16, #tpu.memory_space<vmem>>, %arg7: memref<128x256xbf16, #tpu.memory_space<vmem>>, %arg8: memref<64x256xbf16, #tpu.memory_space<vmem>>, %arg9: memref<256x128xbf16, #tpu.memory_space<vmem>>, %arg10: memref<128x16xbf16, #tpu.memory_space<vmem>>, %arg11: memref<1x16xf32, #tpu.memory_space<vmem>>, %arg12: memref<8x256xf32, #tpu.memory_space<vmem>>, %arg13: memref<8x1xf32, #tpu.memory_space<vmem>>) attributes {dimension_semantics = [#tpu.dimension_semantics<parallel>], iteration_bounds = array<i64: 1>, scalar_prefetch = 0 : i64, scratch_operands = 0 : i64, tpu.core_type = #tpu.core_type<tc>, window_params = [{transform_indices = @transform_0, window_bounds = array<i64: 8, 16, 8>}, {pipeline_mode = #tpu.pipeline_mode<synchronous>, transform_indices = @transform_1, window_bounds = array<i64: 8, 64>}, {pipeline_mode = #tpu.pipeline_mode<synchronous>, transform_indices = @transform_2, window_bounds = array<i64: 64, 64>}, {pipeline_mode = #tpu.pipeline_mode<synchronous>, transform_indices = @transform_3, window_bounds = array<i64: 64, 128>}, {pipeline_mode = #tpu.pipeline_mode<synchronous>, transform_indices = @transform_4, window_bounds = array<i64: 128, 256>}, {pipeline_mode = #tpu.pipeline_mode<synchronous>, transform_indices = @transform_5, window_bounds = array<i64: 256, 256>}, {pipeline_mode = #tpu.pipeline_mode<synchronous>, transform_indices = @transform_6, window_bounds = array<i64: 128, 256>}, {pipeline_mode = #tpu.pipeline_mode<synchronous>, transform_indices = @transform_7, window_bounds = array<i64: 64, 256>}, {pipeline_mode = #tpu.pipeline_mode<synchronous>, transform_indices = @transform_8, window_bounds = array<i64: 256, 128>}, {pipeline_mode = #tpu.pipeline_mode<synchronous>, transform_indices = @transform_9, window_bounds = array<i64: 128, 16>}, {pipeline_mode = #tpu.pipeline_mode<synchronous>, transform_indices = @transform_10, window_bounds = array<i64: 1, 16>}, {pipeline_mode = #tpu.pipeline_mode<synchronous>, transform_indices = @transform_11, window_bounds = array<i64: 8, 256>}, {transform_indices = @transform_12, window_bounds = array<i64: 8, 1>}]} {
    %c0 = arith.constant 0 : index
    %c0_0 = arith.constant 0 : index
    %0 = vector.load %arg12[%c0, %c0_0] : memref<8x256xf32, #tpu.memory_space<vmem>>, vector<1x64xf32>
    %1 = arith.truncf %0 : vector<1x64xf32> to vector<1x64xbf16>
    %c1 = arith.constant 1 : index
    %c0_1 = arith.constant 0 : index
    %2 = vector.load %arg12[%c1, %c0_1] : memref<8x256xf32, #tpu.memory_space<vmem>>, vector<1x64xf32>
    %3 = arith.truncf %2 : vector<1x64xf32> to vector<1x64xbf16>
    %c2 = arith.constant 2 : index
    %c0_2 = arith.constant 0 : index
    %4 = vector.load %arg12[%c2, %c0_2] : memref<8x256xf32, #tpu.memory_space<vmem>>, vector<1x128xf32>
    %5 = arith.truncf %4 : vector<1x128xf32> to vector<1x128xbf16>
    %c3 = arith.constant 3 : index
    %c0_3 = arith.constant 0 : index
    %6 = vector.load %arg12[%c3, %c0_3] : memref<8x256xf32, #tpu.memory_space<vmem>>, vector<1x256xf32>
    %7 = arith.truncf %6 : vector<1x256xf32> to vector<1x256xbf16>
    %c4 = arith.constant 4 : index
    %c0_4 = arith.constant 0 : index
    %8 = vector.load %arg12[%c4, %c0_4] : memref<8x256xf32, #tpu.memory_space<vmem>>, vector<1x256xf32>
    %9 = arith.truncf %8 : vector<1x256xf32> to vector<1x256xbf16>
    %c5 = arith.constant 5 : index
    %c0_5 = arith.constant 0 : index
    %10 = vector.load %arg12[%c5, %c0_5] : memref<8x256xf32, #tpu.memory_space<vmem>>, vector<1x128xf32>
    %11 = arith.truncf %10 : vector<1x128xf32> to vector<1x128xbf16>
    %c6 = arith.constant 6 : index
    %c0_6 = arith.constant 0 : index
    %12 = vector.load %arg12[%c6, %c0_6] : memref<8x256xf32, #tpu.memory_space<vmem>>, vector<1x16xf32>
    %13 = arith.truncf %12 : vector<1x16xf32> to vector<1x16xbf16>
    %c7 = arith.constant 7 : index
    %c0_7 = arith.constant 0 : index
    %14 = vector.load %arg12[%c7, %c0_7] : memref<8x256xf32, #tpu.memory_space<vmem>>, vector<1x1xf32>
    %c0_8 = arith.constant 0 : index
    %c0_9 = arith.constant 0 : index
    %c0_10 = arith.constant 0 : index
    %15 = vector.load %arg1[%c0_8, %c0_9, %c0_10] : memref<8x16x8xf32, #tpu.memory_space<vmem>>, vector<8x16x8xf32>
    %16 = vector.shape_cast %15 : vector<8x16x8xf32> to vector<128x8xf32>
    %17 = arith.truncf %16 : vector<128x8xf32> to vector<128x8xbf16>
    %c0_11 = arith.constant 0 : index
    %c0_12 = arith.constant 0 : index
    %18 = vector.load %arg2[%c0_11, %c0_12] : memref<8x64xbf16, #tpu.memory_space<vmem>>, vector<8x64xbf16>
    %cst = arith.constant dense<0.000000e+00> : vector<128x64xf32>
    %19 = tpu.matmul %17, %18, %cst {dimension_numbers = #tpu.dot_dimension_numbers<[1], [0], [0], [1], [0, 0, 1, 1], [], []>} : vector<128x8xbf16>, vector<8x64xbf16>, vector<128x64xf32> -> vector<128x64xf32>
    %20 = arith.truncf %19 : vector<128x64xf32> to vector<128x64xbf16>
    %21 = vector.broadcast %1 : vector<1x64xbf16> to vector<128x64xbf16>
    %22 = arith.addf %20, %21 : vector<128x64xbf16>
    %cst_13 = arith.constant 0.000000e+00 : bf16
    %23 = vector.broadcast %cst_13 : bf16 to vector<128x64xbf16>
    %24 = arith.maximumf %22, %23 : vector<128x64xbf16>
    %c0_14 = arith.constant 0 : index
    %c0_15 = arith.constant 0 : index
    %25 = vector.load %arg3[%c0_14, %c0_15] : memref<64x64xbf16, #tpu.memory_space<vmem>>, vector<64x64xbf16>
    %cst_16 = arith.constant dense<0.000000e+00> : vector<128x64xf32>
    %26 = tpu.matmul %24, %25, %cst_16 {dimension_numbers = #tpu.dot_dimension_numbers<[1], [0], [0], [1], [0, 0, 1, 1], [], []>} : vector<128x64xbf16>, vector<64x64xbf16>, vector<128x64xf32> -> vector<128x64xf32>
    %27 = arith.truncf %26 : vector<128x64xf32> to vector<128x64xbf16>
    %28 = vector.broadcast %3 : vector<1x64xbf16> to vector<128x64xbf16>
    %29 = arith.addf %27, %28 : vector<128x64xbf16>
    %cst_17 = arith.constant 0.000000e+00 : bf16
    %30 = vector.broadcast %cst_17 : bf16 to vector<128x64xbf16>
    %31 = arith.maximumf %29, %30 : vector<128x64xbf16>
    %c0_18 = arith.constant 0 : index
    %c0_19 = arith.constant 0 : index
    %32 = vector.load %arg4[%c0_18, %c0_19] : memref<64x128xbf16, #tpu.memory_space<vmem>>, vector<64x128xbf16>
    %cst_20 = arith.constant dense<0.000000e+00> : vector<128x128xf32>
    %33 = tpu.matmul %31, %32, %cst_20 {dimension_numbers = #tpu.dot_dimension_numbers<[1], [0], [0], [1], [0, 0, 1, 1], [], []>} : vector<128x64xbf16>, vector<64x128xbf16>, vector<128x128xf32> -> vector<128x128xf32>
    %34 = arith.truncf %33 : vector<128x128xf32> to vector<128x128xbf16>
    %35 = vector.broadcast %5 : vector<1x128xbf16> to vector<128x128xbf16>
    %36 = arith.addf %34, %35 : vector<128x128xbf16>
    %cst_21 = arith.constant 0.000000e+00 : bf16
    %37 = vector.broadcast %cst_21 : bf16 to vector<128x128xbf16>
    %38 = arith.maximumf %36, %37 : vector<128x128xbf16>
    %c0_22 = arith.constant 0 : index
    %c0_23 = arith.constant 0 : index
    %39 = vector.load %arg5[%c0_22, %c0_23] : memref<128x256xbf16, #tpu.memory_space<vmem>>, vector<128x256xbf16>
    %cst_24 = arith.constant dense<0.000000e+00> : vector<128x256xf32>
    %40 = tpu.matmul %38, %39, %cst_24 {dimension_numbers = #tpu.dot_dimension_numbers<[1], [0], [0], [1], [0, 0, 1, 1], [], []>} : vector<128x128xbf16>, vector<128x256xbf16>, vector<128x256xf32> -> vector<128x256xf32>
    %41 = arith.truncf %40 : vector<128x256xf32> to vector<128x256xbf16>
    %42 = vector.broadcast %7 : vector<1x256xbf16> to vector<128x256xbf16>
    %43 = arith.addf %41, %42 : vector<128x256xbf16>
    %cst_25 = arith.constant 0.000000e+00 : bf16
    %44 = vector.broadcast %cst_25 : bf16 to vector<128x256xbf16>
    %45 = arith.maximumf %43, %44 : vector<128x256xbf16>
    %46 = vector.shape_cast %31 : vector<128x64xbf16> to vector<8x16x64xbf16>
    %cst_26 = arith.constant dense<0xFF80> : vector<8x64xbf16>
    %47 = vector.multi_reduction <maximumf>, %46, %cst_26 [1] : vector<8x16x64xbf16> to vector<8x64xbf16>
    %48 = vector.shape_cast %38 : vector<128x128xbf16> to vector<8x16x128xbf16>
    %cst_27 = arith.constant dense<0xFF80> : vector<8x128xbf16>
    %49 = vector.multi_reduction <maximumf>, %48, %cst_27 [1] : vector<8x16x128xbf16> to vector<8x128xbf16>
    %50 = vector.shape_cast %45 : vector<128x256xbf16> to vector<8x16x256xbf16>
    %cst_28 = arith.constant dense<0xFF80> : vector<8x256xbf16>
    %51 = vector.multi_reduction <maximumf>, %50, %cst_28 [1] : vector<8x16x256xbf16> to vector<8x256xbf16>
    %c0_29 = arith.constant 0 : index
    %c0_30 = arith.constant 0 : index
    %52 = vector.load %arg6[%c0_29, %c0_30] : memref<256x256xbf16, #tpu.memory_space<vmem>>, vector<256x256xbf16>
    %cst_31 = arith.constant dense<0.000000e+00> : vector<8x256xf32>
    %53 = tpu.matmul %51, %52, %cst_31 {dimension_numbers = #tpu.dot_dimension_numbers<[1], [0], [0], [1], [0, 0, 1, 1], [], []>} : vector<8x256xbf16>, vector<256x256xbf16>, vector<8x256xf32> -> vector<8x256xf32>
    %c0_32 = arith.constant 0 : index
    %c0_33 = arith.constant 0 : index
    %54 = vector.load %arg7[%c0_32, %c0_33] : memref<128x256xbf16, #tpu.memory_space<vmem>>, vector<128x256xbf16>
    %cst_34 = arith.constant dense<0.000000e+00> : vector<8x256xf32>
    %55 = tpu.matmul %49, %54, %cst_34 {dimension_numbers = #tpu.dot_dimension_numbers<[1], [0], [0], [1], [0, 0, 1, 1], [], []>} : vector<8x128xbf16>, vector<128x256xbf16>, vector<8x256xf32> -> vector<8x256xf32>
    %56 = arith.addf %53, %55 : vector<8x256xf32>
    %c0_35 = arith.constant 0 : index
    %c0_36 = arith.constant 0 : index
    %57 = vector.load %arg8[%c0_35, %c0_36] : memref<64x256xbf16, #tpu.memory_space<vmem>>, vector<64x256xbf16>
    %cst_37 = arith.constant dense<0.000000e+00> : vector<8x256xf32>
    %58 = tpu.matmul %47, %57, %cst_37 {dimension_numbers = #tpu.dot_dimension_numbers<[1], [0], [0], [1], [0, 0, 1, 1], [], []>} : vector<8x64xbf16>, vector<64x256xbf16>, vector<8x256xf32> -> vector<8x256xf32>
    %59 = arith.addf %56, %58 : vector<8x256xf32>
    %60 = arith.truncf %59 : vector<8x256xf32> to vector<8x256xbf16>
    %61 = vector.broadcast %9 : vector<1x256xbf16> to vector<8x256xbf16>
    %62 = arith.addf %60, %61 : vector<8x256xbf16>
    %cst_38 = arith.constant 0.000000e+00 : bf16
    %63 = vector.broadcast %cst_38 : bf16 to vector<8x256xbf16>
    %64 = arith.maximumf %62, %63 : vector<8x256xbf16>
    %c0_39 = arith.constant 0 : index
    %c0_40 = arith.constant 0 : index
    %65 = vector.load %arg9[%c0_39, %c0_40] : memref<256x128xbf16, #tpu.memory_space<vmem>>, vector<256x128xbf16>
    %cst_41 = arith.constant dense<0.000000e+00> : vector<8x128xf32>
    %66 = tpu.matmul %64, %65, %cst_41 {dimension_numbers = #tpu.dot_dimension_numbers<[1], [0], [0], [1], [0, 0, 1, 1], [], []>} : vector<8x256xbf16>, vector<256x128xbf16>, vector<8x128xf32> -> vector<8x128xf32>
    %67 = arith.truncf %66 : vector<8x128xf32> to vector<8x128xbf16>
    %68 = vector.broadcast %11 : vector<1x128xbf16> to vector<8x128xbf16>
    %69 = arith.addf %67, %68 : vector<8x128xbf16>
    %cst_42 = arith.constant 0.000000e+00 : bf16
    %70 = vector.broadcast %cst_42 : bf16 to vector<8x128xbf16>
    %71 = arith.maximumf %69, %70 : vector<8x128xbf16>
    %c0_43 = arith.constant 0 : index
    %c0_44 = arith.constant 0 : index
    %72 = vector.load %arg10[%c0_43, %c0_44] : memref<128x16xbf16, #tpu.memory_space<vmem>>, vector<128x16xbf16>
    %cst_45 = arith.constant dense<0.000000e+00> : vector<8x16xf32>
    %73 = tpu.matmul %71, %72, %cst_45 {dimension_numbers = #tpu.dot_dimension_numbers<[1], [0], [0], [1], [0, 0, 1, 1], [], []>} : vector<8x128xbf16>, vector<128x16xbf16>, vector<8x16xf32> -> vector<8x16xf32>
    %74 = arith.truncf %73 : vector<8x16xf32> to vector<8x16xbf16>
    %75 = vector.broadcast %13 : vector<1x16xbf16> to vector<8x16xbf16>
    %76 = arith.addf %74, %75 : vector<8x16xbf16>
    %cst_46 = arith.constant 0.000000e+00 : bf16
    %77 = vector.broadcast %cst_46 : bf16 to vector<8x16xbf16>
    %78 = arith.maximumf %76, %77 : vector<8x16xbf16>
    %79 = arith.extf %78 : vector<8x16xbf16> to vector<8x16xf32>
    %c0_47 = arith.constant 0 : index
    %c0_48 = arith.constant 0 : index
    %80 = vector.load %arg11[%c0_47, %c0_48] : memref<1x16xf32, #tpu.memory_space<vmem>>, vector<1x16xf32>
    %81 = vector.broadcast %80 : vector<1x16xf32> to vector<8x16xf32>
    %82 = arith.mulf %79, %81 : vector<8x16xf32>
    %cst_49 = arith.constant dense<0.000000e+00> : vector<8xf32>
    %83 = vector.multi_reduction <add>, %82, %cst_49 [1] : vector<8x16xf32> to vector<8xf32>
    %84 = vector.shape_cast %83 : vector<8xf32> to vector<8x1xf32>
    %85 = vector.broadcast %14 : vector<1x1xf32> to vector<8x1xf32>
    %86 = arith.addf %84, %85 : vector<8x1xf32>
    %c0_50 = arith.constant 0 : index
    %c0_51 = arith.constant 0 : index
    %87 = vector.load %arg13[%c0_50, %c0_51] : memref<8x1xf32, #tpu.memory_space<vmem>>, vector<8x1xf32>
    tpu.vector_store %arg13[%c0_50, %c0_51], %86 {strides = array<i32>} : memref<8x1xf32, #tpu.memory_space<vmem>>, vector<8x1xf32>,
    return
  }
  func.func @transform_0(%arg0: i32) -> (i32, i32, i32) {
    %c0_i32 = arith.constant 0 : i32
    %c0_i32_0 = arith.constant 0 : i32
    %c0_i32_1 = arith.constant 0 : i32
    return %arg0, %c0_i32, %c0_i32_0 : i32, i32, i32
  }
  func.func @transform_1(%arg0: i32) -> (i32, i32) {
    %c0_i32 = arith.constant 0 : i32
    %c0_i32_0 = arith.constant 0 : i32
    %c0_i32_1 = arith.constant 0 : i32
    return %c0_i32, %c0_i32_0 : i32, i32
  }
  func.func @transform_2(%arg0: i32) -> (i32, i32) {
    %c0_i32 = arith.constant 0 : i32
    %c0_i32_0 = arith.constant 0 : i32
    %c0_i32_1 = arith.constant 0 : i32
    return %c0_i32, %c0_i32_0 : i32, i32
  }
  func.func @transform_3(%arg0: i32) -> (i32, i32) {
    %c0_i32 = arith.constant 0 : i32
    %c0_i32_0 = arith.constant 0 : i32
    %c0_i32_1 = arith.constant 0 : i32
    return %c0_i32, %c0_i32_0 : i32, i32
  }
  func.func @transform_4(%arg0: i32) -> (i32, i32) {
    %c0_i32 = arith.constant 0 : i32
    %c0_i32_0 = arith.constant 0 : i32
    %c0_i32_1 = arith.constant 0 : i32
    return %c0_i32, %c0_i32_0 : i32, i32
  }
  func.func @transform_5(%arg0: i32) -> (i32, i32) {
    %c0_i32 = arith.constant 0 : i32
    %c0_i32_0 = arith.constant 0 : i32
    %c0_i32_1 = arith.constant 0 : i32
    return %c0_i32, %c0_i32_0 : i32, i32
  }
  func.func @transform_6(%arg0: i32) -> (i32, i32) {
    %c0_i32 = arith.constant 0 : i32
    %c0_i32_0 = arith.constant 0 : i32
    %c0_i32_1 = arith.constant 0 : i32
    return %c0_i32, %c0_i32_0 : i32, i32
  }
  func.func @transform_7(%arg0: i32) -> (i32, i32) {
    %c0_i32 = arith.constant 0 : i32
    %c0_i32_0 = arith.constant 0 : i32
    %c0_i32_1 = arith.constant 0 : i32
    return %c0_i32, %c0_i32_0 : i32, i32
  }
  func.func @transform_8(%arg0: i32) -> (i32, i32) {
    %c0_i32 = arith.constant 0 : i32
    %c0_i32_0 = arith.constant 0 : i32
    %c0_i32_1 = arith.constant 0 : i32
    return %c0_i32, %c0_i32_0 : i32, i32
  }
  func.func @transform_9(%arg0: i32) -> (i32, i32) {
    %c0_i32 = arith.constant 0 : i32
    %c0_i32_0 = arith.constant 0 : i32
    %c0_i32_1 = arith.constant 0 : i32
    return %c0_i32, %c0_i32_0 : i32, i32
  }
  func.func @transform_10(%arg0: i32) -> (i32, i32) {
    %c0_i32 = arith.constant 0 : i32
    %c0_i32_0 = arith.constant 0 : i32
    %c0_i32_1 = arith.constant 0 : i32
    return %c0_i32, %c0_i32_0 : i32, i32
  }
  func.func @transform_11(%arg0: i32) -> (i32, i32) {
    %c0_i32 = arith.constant 0 : i32
    %c0_i32_0 = arith.constant 0 : i32
    %c0_i32_1 = arith.constant 0 : i32
    return %c0_i32, %c0_i32_0 : i32, i32
  }
  func.func @transform_12(%arg0: i32) -> (i32, i32) {
    %c0_i32 = arith.constant 0 : i32
    %c0_i32_0 = arith.constant 0 : i32
    return %arg0, %c0_i32 : i32, i32
  }
}

</mosaic_0001>

<bundles_post_ra>
// kernel: netlocald_forward.1
= control target key start
LH: loop header
LB: loop body
LE: loop exit
PB: predicated region body
PF: predicated region fallthrough
CT: control target
= control target key end

     0   :  { %vm134_vm0 = vcmask 1043456   ;;  %vm109_vm1 = vcmask 64512   ;;  %vm291_vm2 = vcmask 523264   ;;  %v2536_v45 = vmov 0   ;;  %s3211_s1 = inlined_call_operand.vmem [shape: bf16[8,64], index: 1, kind: input, shape index: {}]   ;;  %s3212_s0 = inlined_call_operand.vmem [shape: f32[8,16,8], index: 0, kind: input, shape index: {}]   ;;  %s3213_s2 = inlined_call_operand.vmem [shape: bf16[64,64], index: 2, kind: input, shape index: {}]   ;;  %s3214_s3 = inlined_call_operand.vmem [shape: bf16[64,128], index: 3, kind: input, shape index: {}]   ;;  %s3215_s11 = inlined_call_operand.vmem [shape: f32[8,256], index: 11, kind: input, shape index: {}]   ;;  %s3216_s4 = inlined_call_operand.vmem [shape: bf16[128,256], index: 4, kind: input, shape index: {}]   ;;  %s3217_s6 = inlined_call_operand.vmem [shape: bf16[128,256], index: 6, kind: input, shape index: {}]   ;;  %s3218_s7 = inlined_call_operand.vmem [shape: bf16[64,256], index: 7, kind: input, shape index: {}]   ;;  %s3219_s5 = inlined_call_operand.vmem [shape: bf16[256,256], index: 5, kind: input, shape index: {}]   ;;  %s3220_s8 = inlined_call_operand.vmem [shape: bf16[256,128], index: 8, kind: input, shape index: {}]   ;;  %s3221_s9 = inlined_call_operand.vmem [shape: bf16[128,16], index: 9, kind: input, shape index: {}]   ;;  %s3222_s10 = inlined_call_operand.vmem [shape: f32[1,16], index: 10, kind: input, shape index: {}]   ;;  %s3223_s12 = inlined_call_operand.vmem [shape: f32[8,1], index: 12, kind: output, shape index: {}]  }
   0x1   :  { %v108_v0 = vld [vmem:[%s3211_s1] sm:$0xf]  ;;  %v85_v2 = vld [vmem:[%s3212_s0 + $0x8] sm:$0xff]  ;;  %v86_v5 = vld [vmem:[%s3212_s0 + $0x10] sm:$0xff]  ;;  %vm1286_vm3 = vcmask 1041409   ;;  %vm1288_vm4 = vcmask 1042434  }
   0x2   :  { %v84_v1 = vld [vmem:[%s3212_s0] sm:$0xff]  ;;  %2392 = vmatprep.subr.msk.bf16.mxu0 %vm134_vm0, %v108_v0  ;;  %v136_v3 = vsel %vm134_vm0, %v108_v0, 0  ;;  %v87_v6 = vld [vmem:[%s3212_s0 + $0x18] sm:$0xff]  ;;  %v89_v9 = vld [vmem:[%s3212_s0 + $0x28] sm:$0xff]  ;;  %vm1290_vm5 = vcmask 1043459   ;;  %vm1292_vm6 = vcmask 1044484  }
   0x3   :  { %v100_v4 = vpack.c.bf16 %v85_v2, %v84_v1  ;;  %v88_v7 = vld [vmem:[%s3212_s0 + $0x20] sm:$0xff]  ;;  %2307 = vmatpush3.bf16.msra.mxu0 %v136_v3  ;;  %v101_v8 = vpack.c.bf16 %v87_v6, %v86_v5  ;;  %v90_v11 = vld [vmem:[%s3212_s0 + $0x30] sm:$0xff]  ;;  %v91_v12 = vld [vmem:[%s3212_s0 + $0x38] sm:$0xff]  ;;  %vm1294_vm7 = vcmask 1045509   ;;  %vm1296_vm8 = vcmask 1046534  }
   0x4   :  { %v102_v10 = vpack.c.bf16 %v89_v9, %v88_v7  ;;  %v92_v13 = vld [vmem:[%s3212_s0 + $0x40] sm:$0xff]  ;;  %v93_v14 = vld [vmem:[%s3212_s0 + $0x48] sm:$0xff]  ;;  %v2396_v15 = vld [vmem:[%s3213_s2 + $0x18] sm:$0xff]   ;;  %v103_v16 = vpack.c.bf16 %v91_v12, %v90_v11  ;;  %vm1298_vm9 = vcmask 1047559   ;;  %vm2538_vm10 = vmmov 0  }
   0x5   :  { %2308 = vmatprep.mubr.msk.bf16.mxu0 %vm109_vm1, %v100_v4  ;;  %2324 = vmatprep.subr.bf16.mxu1 %v2396_v15  ;;  %v104_v17 = vpack.c.bf16 %v93_v14, %v92_v13  ;;  %v94_v18 = vld [vmem:[%s3212_s0 + $0x50] sm:$0xff]  ;;  %v95_v19 = vld [vmem:[%s3212_s0 + $0x58] sm:$0xff]  ;;  %v96_v20 = vld [vmem:[%s3212_s0 + $0x60] sm:$0xff]  ;;  %vm2099_vm11 = vcmask 130048   ;;  %vm2104_vm12 = vcmask 7168  }
   0x6   :  { %2309 = vmatmul.mubr.msk.bf16.vlgmr.msra.gmra.mxu0 %vm109_vm1, %v101_v8  ;;  %2325 = vmatpush3.bf16.msra.mxu1 %v2396_v15  ;;  %v97_v21 = vld [vmem:[%s3212_s0 + $0x68] sm:$0xff]  ;;  %v105_v22 = vpack.c.bf16 %v95_v19, %v94_v18  ;;  %v98_v24 = vld [vmem:[%s3212_s0 + $0x70] sm:$0xff]  ;;  %v99_v25 = vld [vmem:[%s3212_s0 + $0x78] sm:$0xff] }
   0x7   :  { %2312 = vmatprep.mubr.msk.bf16.mxu0 %vm109_vm1, %v102_v10  ;;  %v106_v23 = vpack.c.bf16 %v97_v21, %v96_v20  ;;  %v107_v26 = vpack.c.bf16 %v99_v25, %v98_v24  ;;  %v2397_v27 = vld [vmem:[%s3213_s2 + $0x10] sm:$0xff]   ;;  %v2398_v28 = vld [vmem:[%s3213_s2 + $0x8] sm:$0xff]   ;;  %v2399_v29 = vld [vmem:[%s3213_s2] sm:$0xff]  }
   0x8   :  { %2326 = vmatprep.subr.bf16.mxu1 %v2397_v27  ;;  %v2400_v30 = vld [vmem:[%s3214_s3 + $0x18] sm:$0xff]   ;;  %v2401_v31 = vld [vmem:[%s3214_s3 + $0x10] sm:$0xff]   ;;  %v2402_v32 = vld [vmem:[%s3214_s3 + $0x8] sm:$0xff]  }
   0x9   :  { %2348 = vmatprep.subr.bf16.mxu0 %v2400_v30  ;;  %v43_v34 = vld [vmem:[%s3215_s11] ss:$0 sm:$0xff]  ;;  %v2404_v13 = vld [vmem:[%s3216_s4 + $0x70] ss:$8 sps:$4 sm:$0xff]   ;;  %v2406_v14 = vld [vmem:[%s3216_s4 + $0x74] ss:$8 sps:$4 sm:$0xff]  }
   0xa   :  { %2327 = vmatpush3.bf16.msra.mxu1 %v2397_v27  ;;  %2349 = vmatpush3.bf16.msra.mxu0 %v2400_v30  ;;  %v44_v36 = vpack.c.bf16 %v43_v34, %v43_v34  ;;  %v2403_v12 = vld [vmem:[%s3214_s3] sm:$0xff]   ;;  %v2410_v18 = vld [vmem:[%s3216_s4 + $0x50] ss:$8 sps:$4 sm:$0xff]   ;;  %v2418_v21 = vld [vmem:[%s3216_s4 + $0x34] ss:$8 sps:$4 sm:$0xff]  }
   0xb   :  { %2328 = vmatprep.subr.bf16.mxu1 %v2398_v28  ;;  %2350 = vmatprep.subr.bf16.mxu0 %v2401_v31  ;;  %v2409_v15 = vld [vmem:[%s3216_s4 + $0x64] ss:$8 sps:$4 sm:$0xff]   ;;  %v2413_v20 = vld [vmem:[%s3216_s4 + $0x40] ss:$8 sps:$4 sm:$0xff]  }
   0xc   :  { %v2415_v19 = vld [vmem:[%s3216_s4 + $0x44] ss:$8 sps:$4 sm:$0xff]   ;;  %v45_v24 = vld [vmem:[%s3215_s11 + $0x1] ss:$0 sm:$0xff] }
   0xe   :  { %2313 = vmatmul.mubr.msk.bf16.gmra.mxu0 %vm109_vm1, %v103_v16  ;;  %2329 = vmatpush3.bf16.msra.mxu1 %v2398_v28  ;;  %v2407_v16 = vld [vmem:[%s3216_s4 + $0x60] ss:$8 sps:$4 sm:$0xff]  }
   0xf   :  { %2316 = vmatprep.mubr.msk.bf16.mxu0 %vm109_vm1, %v104_v17  ;;  %2330 = vmatprep.subr.bf16.mxu1 %v2399_v29  ;;  %v2412_v17 = vld [vmem:[%s3216_s4 + $0x54] ss:$8 sps:$4 sm:$0xff]  }
  0x10   :  { %2351 = vmatpush3.bf16.msra.mxu0 %v2401_v31 }
  0x11   :  { %2352 = vmatprep.subr.bf16.mxu0 %v2402_v32 }
  0x12   :  { %2331 = vmatpush3.bf16.msra.mxu1 %v2399_v29 }
  0x13   :  { %710 = vmatprep.subr.bf16.mxu1 %v2406_v14 }
  0x14   :  { %2353 = vmatpush3.bf16.msra.mxu0 %v2402_v32 }
  0x15   :  { %2354 = vmatprep.subr.bf16.mxu0 %v2403_v12 }
  0x16   :  { %2317 = vmatmul.mubr.msk.bf16.gmra.mxu0 %vm109_vm1, %v105_v22  ;;  %v2416_v22 = vld [vmem:[%s3216_s4 + $0x30] ss:$8 sps:$4 sm:$0xff]  }
  0x17   :  { %2320 = vmatprep.mubr.msk.bf16.mxu0 %vm109_vm1, %v106_v23 }
  0x18   :  { %2355 = vmatpush3.bf16.msra.mxu0 %v2403_v12 }
  0x1e   :  { %2321 = vmatmul.mubr.msk.bf16.gmra.mxu0 %vm109_vm1, %v107_v26  ;;  %v2740_v26 = vpack.c.bf16 %v45_v24, %v45_v24 }
  0xc6   :  { %v2310_v33 = vpop.f32.mrf.mxu0 }
  0xc8   :  { %v172_v35 = vpop.f32.mrf.mxu0 }
  0xca   :  { %v2311_v37 = vpop.f32.mrf.mxu0 }
  0xcb   :  { %v236_v38 = vpack.c.bf16 %v2311_v37, %v2310_v33 }
  0xcc   :  { %v175_v39 = vpop.f32.mrf.mxu0 }
  0xcd   :  { %v235_v40 = vpack.c.bf16 %v175_v39, %v172_v35  ;;  %v244_v41 = vadd.bf16 %v236_v38, %v44_v36 }
  0xce   :  { %v2314_v42 = vpop.f32.mrf.mxu0 }
  0xcf   :  { %v243_v43 = vadd.bf16 %v235_v40, %v44_v36  ;;  %v252_v47 = vmax.bf16 %v2536_v45, %v244_v41 }
  0xd0   :  { %v188_v44 = vpop.f32.mrf.mxu0 }
  0xd1   :  { %v251_v46 = vmax.bf16 %v2536_v45, %v243_v43 }
  0xd2   :  { %v2315_v48 = vpop.f32.mrf.mxu0 }
  0xd3   :  { %v238_v49 = vpack.c.bf16 %v2315_v48, %v2314_v42  ;;  %2332 = vmatprep.mubr.msk.bf16.mxu1 %vm291_vm2, %v251_v46 }
  0xd4   :  { %v191_v50 = vpop.f32.mrf.mxu0  ;;  %2333 = vmatmul.mubr.msk.bf16.vlgmr.msra.gmra.mxu1 %vm291_vm2, %v252_v47 }
  0xd5   :  { %v246_v51 = vadd.bf16 %v238_v49, %v44_v36  ;;  %v237_v52 = vpack.c.bf16 %v191_v50, %v188_v44  ;;  %711 = vmatpush1.bf16.msra.mxu1 %v2404_v13 }
  0xd6   :  { %v2318_v53 = vpop.f32.mrf.mxu0  ;;  %712 = vmatprep.subr.bf16.mxu1 %v2409_v15 }
  0xd7   :  { %v245_v54 = vadd.bf16 %v237_v52, %v44_v36  ;;  %v254_v55 = vmax.bf16 %v2536_v45, %v246_v51 }
  0xd8   :  { %v204_v56 = vpop.f32.mrf.mxu0 }
  0xd9   :  { %v253_v57 = vmax.bf16 %v2536_v45, %v245_v54  ;;  %713 = vmatpush1.bf16.msra.mxu1 %v2407_v16 }
  0xda   :  { %v2319_v58 = vpop.f32.mrf.mxu0  ;;  %714 = vmatprep.subr.bf16.mxu1 %v2412_v17 }
  0xdb   :  { %v240_v59 = vpack.c.bf16 %v2319_v58, %v2318_v53  ;;  %2336 = vmatprep.mubr.msk.bf16.mxu1 %vm291_vm2, %v253_v57 }
  0xdc   :  { %v207_v60 = vpop.f32.mrf.mxu0  ;;  %2337 = vmatmul.mubr.msk.bf16.gmra.mxu1 %vm291_vm2, %v254_v55 }
  0xdd   :  { %v248_v61 = vadd.bf16 %v240_v59, %v44_v36  ;;  %v239_v62 = vpack.c.bf16 %v207_v60, %v204_v56  ;;  %715 = vmatpush1.bf16.msra.mxu1 %v2410_v18 }
  0xde   :  { %v2322_v63 = vpop.f32.mrf.mxu0  ;;  %716 = vmatprep.subr.bf16.mxu1 %v2415_v19 }
  0xdf   :  { %v247_v0 = vadd.bf16 %v239_v62, %v44_v36  ;;  %v256_v1 = vmax.bf16 %v2536_v45, %v248_v61 }
  0xe0   :  { %v220_v2 = vpop.f32.mrf.mxu0 }
  0xe1   :  { %v255_v3 = vmax.bf16 %v2536_v45, %v247_v0  ;;  %717 = vmatpush1.bf16.msra.mxu1 %v2413_v20 }
  0xe2   :  { %v2323_v4 = vpop.f32.mrf.mxu0  ;;  %718 = vmatprep.subr.bf16.mxu1 %v2418_v21 }
  0xe3   :  { %v242_v5 = vpack.c.bf16 %v2323_v4, %v2322_v63  ;;  %2340 = vmatprep.mubr.msk.bf16.mxu1 %vm291_vm2, %v255_v3 }
  0xe4   :  { %v223_v6 = vpop.f32.mrf.mxu0  ;;  %2341 = vmatmul.mubr.msk.bf16.gmra.mxu1 %vm291_vm2, %v256_v1 }
  0xe5   :  { %v250_v7 = vadd.bf16 %v242_v5, %v44_v36  ;;  %v241_v8 = vpack.c.bf16 %v223_v6, %v220_v2  ;;  %719 = vmatpush1.bf16.msra.mxu1 %v2416_v22 }
  0xe7   :  { %v249_v9 = vadd.bf16 %v241_v8, %v44_v36  ;;  %v258_v10 = vmax.bf16 %v2536_v45, %v250_v7 }
  0xe9   :  { %v257_v11 = vmax.bf16 %v2536_v45, %v249_v9 }
  0xeb   :  { %2344 = vmatprep.mubr.msk.bf16.mxu1 %vm291_vm2, %v257_v11 }
  0xec   :  { %2345 = vmatmul.mubr.msk.bf16.gmra.mxu1 %vm291_vm2, %v258_v10 }
  0xed   :  { %742 = vmatprep.mubr.bf16.mxu1 %v2536_v45 }
 0x194   :  { %v2334_v23 = vpop.f32.mrf.mxu1 }
 0x196   :  { %v350_v25 = vpop.f32.mrf.mxu1 }
 0x198   :  { %v2335_v27 = vpop.f32.mrf.mxu1 }
 0x199   :  { %v414_v28 = vpack.c.bf16 %v2335_v27, %v2334_v23 }
 0x19a   :  { %v353_v29 = vpop.f32.mrf.mxu1 }
 0x19b   :  { %v422_v30 = vadd.bf16 %v414_v28, %v2740_v26  ;;  %v413_v31 = vpack.c.bf16 %v353_v29, %v350_v25 }
 0x19c   :  { %v2338_v32 = vpop.f32.mrf.mxu1 }
 0x19d   :  { %v430_v33 = vmax.bf16 %v2536_v45, %v422_v30  ;;  %v421_v34 = vadd.bf16 %v413_v31, %v2740_v26 }
 0x19e   :  { %v366_v35 = vpop.f32.mrf.mxu1 }
 0x19f   :  { %v898_v36 = vsel %vm291_vm2, %v430_v33, 4286644096  ;;  %v429_v37 = vmax.bf16 %v2536_v45, %v421_v34 }
 0x1a0   :  { %v900_v38 = vunpack.i.l.bf16 %v898_v36  ;;  %v901_v39 = vunpack.i.h.bf16 %v898_v36  ;;  %v2339_v40 = vpop.f32.mrf.mxu1 }
 0x1a1   :  { %v886_v41 = vsel %vm291_vm2, %v429_v37, 4286644096  ;;  %v416_v42 = vpack.c.bf16 %v2339_v40, %v2338_v32  ;;  %2356 = vmatprep.mubr.msk.bf16.mxu0 %vm291_vm2, %v429_v37 }
 0x1a2   :  { %v902_v43 = vmax.f32 %v900_v38, %v901_v39  ;;  %v888_v44 = vunpack.i.l.bf16 %v886_v41  ;;  %v889_v46 = vunpack.i.h.bf16 %v886_v41  ;;  %v369_v47 = vpop.f32.mrf.mxu1  ;;  %2357 = vmatmul.mubr.msk.bf16.vlgmr.msra.gmra.mxu0 %vm291_vm2, %v430_v33 }
 0x1a3   :  { %v424_v48 = vadd.bf16 %v416_v42, %v2740_v26  ;;  %v415_v49 = vpack.c.bf16 %v369_v47, %v366_v35 }
 0x1a4   :  { %v903_v50 = vrot.slane %v902_v43, 4  ;;  %v890_v51 = vmax.f32 %v888_v44, %v889_v46  ;;  %v2342_v52 = vpop.f32.mrf.mxu1 }
 0x1a5   :  { %v432_v53 = vmax.bf16 %v2536_v45, %v424_v48  ;;  %v423_v54 = vadd.bf16 %v415_v49, %v2740_v26 }
 0x1a6   :  { %v904_v55 = vmax.f32 %v902_v43, %v903_v50  ;;  %v891_v56 = vrot.slane %v890_v51, 4  ;;  %v382_v57 = vpop.f32.mrf.mxu1 }
 0x1a7   :  { %v922_v58 = vsel %vm291_vm2, %v432_v53, 4286644096  ;;  %v431_v59 = vmax.bf16 %v2536_v45, %v423_v54 }
 0x1a8   :  { %v905_v60 = vrot.slane %v904_v55, 2  ;;  %v892_v61 = vmax.f32 %v890_v51, %v891_v56  ;;  %v924_v62 = vunpack.i.l.bf16 %v922_v58  ;;  %v925_v63 = vunpack.i.h.bf16 %v922_v58  ;;  %v2343_v0 = vpop.f32.mrf.mxu1 }
 0x1a9   :  { %v910_v1 = vsel %vm291_vm2, %v431_v59, 4286644096  ;;  %v418_v2 = vpack.c.bf16 %v2343_v0, %v2342_v52  ;;  %2360 = vmatprep.mubr.msk.bf16.mxu0 %vm291_vm2, %v431_v59 }
 0x1aa   :  { %v906_v3 = vmax.f32 %v904_v55, %v905_v60  ;;  %v893_v4 = vrot.slane %v892_v61, 2  ;;  %v926_v5 = vmax.f32 %v924_v62, %v925_v63  ;;  %v912_v6 = vunpack.i.l.bf16 %v910_v1  ;;  %v385_v7 = vpop.f32.mrf.mxu1  ;;  %2361 = vmatmul.mubr.msk.bf16.gmra.mxu0 %vm291_vm2, %v432_v53 }
 0x1ab   :  { %v913_v8 = vunpack.i.h.bf16 %v910_v1  ;;  %v426_v9 = vadd.bf16 %v418_v2, %v2740_v26  ;;  %v417_v10 = vpack.c.bf16 %v385_v7, %v382_v57 }
 0x1ac   :  { %v907_v11 = vrot.slane %v906_v3, 1  ;;  %v894_v12 = vmax.f32 %v892_v61, %v893_v4  ;;  %v927_v13 = vrot.slane %v926_v5, 4  ;;  %v2346_v14 = vpop.f32.mrf.mxu1 }
 0x1ad   :  { %v914_v15 = vmax.f32 %v912_v6, %v913_v8  ;;  %v434_v16 = vmax.bf16 %v2536_v45, %v426_v9  ;;  %v425_v17 = vadd.bf16 %v417_v10, %v2740_v26 }
 0x1ae   :  { %v908_v18 = vmax.f32 %v906_v3, %v907_v11  ;;  %v895_v19 = vrot.slane %v894_v12, 1  ;;  %v928_v20 = vmax.f32 %v926_v5, %v927_v13  ;;  %v398_v21 = vpop.f32.mrf.mxu1 }
 0x1af   :  { %v915_v22 = vrot.slane %v914_v15, 4  ;;  %v946_v23 = vsel %vm291_vm2, %v434_v16, 4286644096  ;;  %v433_v24 = vmax.bf16 %v2536_v45, %v425_v17 }
 0x1b0   :  { %v909_v25 = vpack.i.bf16 %v908_v18, %v908_v18  ;;  %v896_v27 = vmax.f32 %v894_v12, %v895_v19  ;;  %v929_v28 = vrot.slane %v928_v20, 2  ;;  %v948_v29 = vunpack.i.l.bf16 %v946_v23  ;;  %v2347_v30 = vpop.f32.mrf.mxu1 }
 0x1b1   :  { %v916_v31 = vmax.f32 %v914_v15, %v915_v22  ;;  %v949_v32 = vunpack.i.h.bf16 %v946_v23  ;;  %v934_v33 = vsel %vm291_vm2, %v433_v24, 4286644096  ;;  %v420_v34 = vpack.c.bf16 %v2347_v30, %v2346_v14  ;;  %2364 = vmatprep.mubr.msk.bf16.mxu0 %vm291_vm2, %v433_v24 }
 0x1b2   :  { %v897_v35 = vpack.i.bf16 %v896_v27, %v896_v27  ;;  %v930_v36 = vmax.f32 %v928_v20, %v929_v28  ;;  %v936_v37 = vunpack.i.l.bf16 %v934_v33  ;;  %v401_v38 = vpop.f32.mrf.mxu1  ;;  %2365 = vmatmul.mubr.msk.bf16.gmra.mxu0 %vm291_vm2, %v434_v16  ;;  %v937_v41 = vunpack.i.h.bf16 %v934_v33 }
 0x1b3   :  { %v917_v39 = vrot.slane %v916_v31, 2  ;;  %v950_v40 = vmax.f32 %v948_v29, %v949_v32  ;;  %v428_v42 = vadd.bf16 %v420_v34, %v2740_v26  ;;  %v1691_v43 = vunpack.c.l.b16 %v909_v25 }
 0x1b4   :  { %v1690_v44 = vunpack.c.l.b16 %v897_v35  ;;  %v931_v46 = vrot.slane %v930_v36, 1  ;;  %v419_v47 = vpack.c.bf16 %v401_v38, %v398_v21  ;;  %v938_v50 = vmax.f32 %v936_v37, %v937_v41 }
 0x1b5   :  { %v918_v48 = vmax.f32 %v916_v31, %v917_v39  ;;  %v951_v49 = vrot.slane %v950_v40, 4  ;;  %v436_v51 = vmax.bf16 %v2536_v45, %v428_v42 }
 0x1b6   :  { %v1698_v52 = vsel %vm1286_vm3, %v1691_v43, %v1690_v44  ;;  %v932_v53 = vmax.f32 %v930_v36, %v931_v46  ;;  %v427_v54 = vadd.bf16 %v419_v47, %v2740_v26  ;;  %v939_v57 = vrot.slane %v938_v50, 4  ;;  %v2419_v43 = vld [vmem:[%s3216_s4 + $0x20] ss:$8 sps:$4 sm:$0xff]   ;;  %v2421_v44 = vld [vmem:[%s3216_s4 + $0x24] ss:$8 sps:$4 sm:$0xff]  }
 0x1b7   :  { %v919_v55 = vrot.slane %v918_v48, 1  ;;  %v952_v56 = vmax.f32 %v950_v40, %v951_v49  ;;  %v970_v58 = vsel %vm291_vm2, %v436_v51, 4286644096  ;;  %720 = vmatprep.subr.bf16.mxu1 %v2421_v44  ;;  %v2424_v46 = vld [vmem:[%s3216_s4 + $0x14] ss:$8 sps:$4 sm:$0xff]  }
 0x1b8   :  { %v972_v59 = vunpack.i.l.bf16 %v970_v58  ;;  %v973_v60 = vunpack.i.h.bf16 %v970_v58  ;;  %v435_v61 = vmax.bf16 %v2536_v45, %v427_v54  ;;  %v940_v0 = vmax.f32 %v938_v50, %v939_v57  ;;  %721 = vmatpush1.bf16.msra.mxu1 %v2419_v43  ;;  %v2422_v47 = vld [vmem:[%s3216_s4 + $0x10] ss:$8 sps:$4 sm:$0xff]   ;;  %v2425_v49 = vld [vmem:[%s3216_s4] ss:$8 sps:$4 sm:$0xff]   ;;  %v2430_v50 = vld [vmem:[%s3217_s6 + $0x74] ss:$8 sps:$4 sm:$0xff]  }
 0x1b9   :  { %v920_v62 = vmax.f32 %v918_v48, %v919_v55  ;;  %v953_v63 = vrot.slane %v952_v56, 2  ;;  %v933_v1 = vpack.i.bf16 %v932_v53, %v932_v53  ;;  %722 = vmatprep.subr.bf16.mxu1 %v2424_v46  ;;  %v2427_v48 = vld [vmem:[%s3216_s4 + $0x4] ss:$8 sps:$4 sm:$0xff]   ;;  %1382 = vmatprep.subr.bf16.mxu0 %v2430_v50  ;;  %v2431_v53 = vld [vmem:[%s3217_s6 + $0x60] ss:$8 sps:$4 sm:$0xff]  }
 0x1ba   :  { %v974_v2 = vmax.f32 %v972_v59, %v973_v60  ;;  %v958_v3 = vsel %vm291_vm2, %v435_v61, 4286644096  ;;  %2368 = vmatprep.mubr.msk.bf16.mxu0 %vm291_vm2, %v435_v61  ;;  %v941_v5 = vrot.slane %v940_v0, 2  ;;  %v2436_v54 = vld [vmem:[%s3217_s6 + $0x54] ss:$8 sps:$4 sm:$0xff]  }
 0x1bb   :  { %v921_v4 = vpack.i.bf16 %v920_v62, %v920_v62  ;;  %v954_v26 = vmax.f32 %v952_v56, %v953_v63  ;;  %v960_v6 = vunpack.i.l.bf16 %v958_v3  ;;  %2369 = vmatmul.mubr.msk.bf16.gmra.mxu0 %vm291_vm2, %v436_v51  ;;  %v961_v8 = vunpack.i.h.bf16 %v958_v3  ;;  %v2428_v51 = vld [vmem:[%s3217_s6 + $0x70] ss:$8 sps:$4 sm:$0xff]   ;;  %v2439_v56 = vld [vmem:[%s3217_s6 + $0x44] ss:$8 sps:$4 sm:$0xff]   ;;  %v2437_v57 = vld [vmem:[%s3217_s6 + $0x40] ss:$8 sps:$4 sm:$0xff]  }
 0x1bc   :  { %v975_v7 = vrot.slane %v974_v2, 4  ;;  %1414 = vmatprep.mubr.bf16.mxu0 %v2536_v45  ;;  %v942_v11 = vmax.f32 %v940_v0, %v941_v5  ;;  %v1693_v12 = vunpack.c.l.b16 %v933_v1  ;;  %723 = vmatpush1.bf16.msra.mxu1 %v2422_v47  ;;  %v2434_v55 = vld [vmem:[%s3217_s6 + $0x50] ss:$8 sps:$4 sm:$0xff]   ;;  %v2442_v58 = vld [vmem:[%s3217_s6 + $0x34] ss:$8 sps:$4 sm:$0xff]  }
 0x1bd   :  { %v1692_v9 = vunpack.c.l.b16 %v921_v4  ;;  %v955_v10 = vrot.slane %v954_v26, 1  ;;  %v962_v14 = vmax.f32 %v960_v6, %v961_v8  ;;  %724 = vmatprep.subr.bf16.mxu1 %v2427_v48  ;;  %1383 = vmatpush1.bf16.msra.mxu0 %v2428_v51  ;;  %v2440_v59 = vld [vmem:[%s3217_s6 + $0x30] ss:$8 sps:$4 sm:$0xff]   ;;  %v2445_v60 = vld [vmem:[%s3217_s6 + $0x24] ss:$8 sps:$4 sm:$0xff]  }
 0x1be   :  { %v976_v13 = vmax.f32 %v974_v2, %v975_v7  ;;  %v943_v17 = vrot.slane %v942_v11, 1  ;;  %v2443_v61 = vld [vmem:[%s3217_s6 + $0x20] ss:$8 sps:$4 sm:$0xff]   ;;  %v2448_v62 = vld [vmem:[%s3217_s6 + $0x14] ss:$8 sps:$4 sm:$0xff]  }
 0x1bf   :  { %v1699_v15 = vsel %vm1288_vm4, %v1692_v9, %v1698_v52  ;;  %v956_v16 = vmax.f32 %v954_v26, %v955_v10  ;;  %v963_v19 = vrot.slane %v962_v14, 4  ;;  %v2433_v52 = vld [vmem:[%s3217_s6 + $0x64] ss:$8 sps:$4 sm:$0xff]   ;;  %v2446_v63 = vld [vmem:[%s3217_s6 + $0x10] ss:$8 sps:$4 sm:$0xff]  }
 0x1c0   :  { %v977_v18 = vrot.slane %v976_v13, 2  ;;  %v1700_v20 = vsel %vm1290_vm5, %v1693_v12, %v1699_v15  ;;  %v944_v21 = vmax.f32 %v942_v11, %v943_v17  ;;  %725 = vmatpush1.bf16.msra.mxu1 %v2425_v49  ;;  %1384 = vmatprep.subr.bf16.mxu0 %v2433_v52  ;;  %v2451_v0 = vld [vmem:[%s3217_s6 + $0x4] ss:$8 sps:$4 sm:$0xff]   ;;  %v2449_v1 = vld [vmem:[%s3217_s6] ss:$8 sps:$4 sm:$0xff]  }
 0x1c1   :  { %v957_v22 = vpack.i.bf16 %v956_v16, %v956_v16  ;;  %v964_v24 = vmax.f32 %v962_v14, %v963_v19  ;;  %1385 = vmatpush1.bf16.msra.mxu0 %v2431_v53  ;;  %v2454_v2 = vld [vmem:[%s3218_s7 + $0x34] ss:$8 sps:$4 sm:$0xff]   ;;  %v47_v4 = vld [vmem:[%s3215_s11 + $0x2] ss:$0 sm:$0xff] }
 0x1c2   :  { %v978_v23 = vmax.f32 %v976_v13, %v977_v18  ;;  %v945_v25 = vpack.i.bf16 %v944_v21, %v944_v21  ;;  %1386 = vmatprep.subr.bf16.mxu0 %v2436_v54  ;;  %v2856_v5 = vpack.c.bf16 %v47_v4, %v47_v4 }
 0x1c3   :  { %v965_v28 = vrot.slane %v964_v24, 2  ;;  %v1695_v30 = vunpack.c.l.b16 %v957_v22 }
 0x1c4   :  { %v979_v27 = vrot.slane %v978_v23, 1  ;;  %v1694_v29 = vunpack.c.l.b16 %v945_v25 }
 0x1c5   :  { %v966_v32 = vmax.f32 %v964_v24, %v965_v28  ;;  %1387 = vmatpush1.bf16.msra.mxu0 %v2434_v55 }
 0x1c6   :  { %v980_v31 = vmax.f32 %v978_v23, %v979_v27  ;;  %v1701_v33 = vsel %vm1292_vm6, %v1694_v29, %v1700_v20  ;;  %1388 = vmatprep.subr.bf16.mxu0 %v2439_v56 }
 0x1c7   :  { %v967_v34 = vrot.slane %v966_v32, 1  ;;  %v1702_v35 = vsel %vm1294_vm7, %v1695_v30, %v1701_v33 }
 0x1c8   :  { %v981_v36 = vpack.i.bf16 %v980_v31, %v980_v31 }
 0x1c9   :  { %v968_v37 = vmax.f32 %v966_v32, %v967_v34  ;;  %1389 = vmatpush1.bf16.msra.mxu0 %v2437_v57 }
 0x1ca   :  { %v1697_v39 = vunpack.c.l.b16 %v981_v36  ;;  %1390 = vmatprep.subr.bf16.mxu0 %v2442_v58 }
 0x1cb   :  { %v969_v38 = vpack.i.bf16 %v968_v37, %v968_v37 }
 0x1cd   :  { %v1696_v40 = vunpack.c.l.b16 %v969_v38  ;;  %1391 = vmatpush1.bf16.msra.mxu0 %v2440_v59 }
 0x1ce   :  { %1392 = vmatprep.subr.bf16.mxu0 %v2445_v60 }
 0x1cf   :  { %v1703_v41 = vsel %vm1296_vm8, %v1696_v40, %v1702_v35 }
 0x1d0   :  { %v2782_v42 = vsel %vm1298_vm9, %v1697_v39, %v1703_v41 }
 0x1d1   :  { %1393 = vmatpush1.bf16.msra.mxu0 %v2443_v61 }
 0x1d2   :  { %1394 = vmatprep.subr.bf16.mxu0 %v2448_v62 }
 0x1d5   :  { %1395 = vmatpush1.bf16.msra.mxu0 %v2446_v63 }
 0x1d6   :  { %1396 = vmatprep.subr.bf16.mxu0 %v2451_v0 }
 0x1d9   :  { %1397 = vmatpush1.bf16.msra.mxu0 %v2449_v1 }
 0x1da   :  { %1757 = vmatprep.subr.bf16.mxu0 %v2454_v2 }
 0x262   :  { %v2358_v3 = vpop.f32.mrf.mxu0 }
 0x264   :  { %v527_v26 = vpop.f32.mrf.mxu0 }
 0x266   :  { %v2359_v6 = vpop.f32.mrf.mxu0 }
 0x267   :  { %v591_v7 = vpack.c.bf16 %v2359_v6, %v2358_v3 }
 0x268   :  { %v530_v8 = vpop.f32.mrf.mxu0 }
 0x269   :  { %v599_v9 = vadd.bf16 %v591_v7, %v2856_v5  ;;  %v590_v10 = vpack.c.bf16 %v530_v8, %v527_v26 }
 0x26a   :  { %v2362_v11 = vpop.f32.mrf.mxu0 }
 0x26b   :  { %v598_v12 = vadd.bf16 %v590_v10, %v2856_v5  ;;  %v607_v13 = vmax.bf16 %v2536_v45, %v599_v9 }
 0x26c   :  { %v543_v14 = vpop.f32.mrf.mxu0 }
 0x26d   :  { %v606_v15 = vmax.bf16 %v2536_v45, %v598_v12  ;;  %v992_v16 = vunpack.i.l.bf16 %v607_v13  ;;  %v993_v17 = vunpack.i.h.bf16 %v607_v13 }
 0x26e   :  { %v2363_v18 = vpop.f32.mrf.mxu0 }
 0x26f   :  { %v982_v19 = vunpack.i.l.bf16 %v606_v15  ;;  %v983_v20 = vunpack.i.h.bf16 %v606_v15  ;;  %v593_v21 = vpack.c.bf16 %v2363_v18, %v2362_v11  ;;  %743 = vmatmul.mubr.bf16.vlgmr.msra.gmra.mxu1 %v606_v15  ;;  %v994_v27 = vmax.f32 %v992_v16, %v993_v17 }
 0x270   :  { %v546_v22 = vpop.f32.mrf.mxu0  ;;  %752 = vmatprep.mubr.bf16.mxu1 %v2536_v45 }
 0x271   :  { %v984_v23 = vmax.f32 %v982_v19, %v983_v20  ;;  %v601_v24 = vadd.bf16 %v593_v21, %v2856_v5  ;;  %v592_v25 = vpack.c.bf16 %v546_v22, %v543_v14  ;;  %v995_v33 = vrot.slane %v994_v27, 4 }
 0x272   :  { %v2366_v28 = vpop.f32.mrf.mxu0 }
 0x273   :  { %v600_v29 = vadd.bf16 %v592_v25, %v2856_v5  ;;  %v609_v30 = vmax.bf16 %v2536_v45, %v601_v24  ;;  %v985_v31 = vrot.slane %v984_v23, 4  ;;  %v996_v47 = vmax.f32 %v994_v27, %v995_v33 }
 0x274   :  { %v559_v32 = vpop.f32.mrf.mxu0 }
 0x275   :  { %v608_v34 = vmax.bf16 %v2536_v45, %v600_v29  ;;  %v1012_v35 = vunpack.i.l.bf16 %v609_v30  ;;  %v1013_v37 = vunpack.i.h.bf16 %v609_v30  ;;  %v986_v40 = vmax.f32 %v984_v23, %v985_v31 }
 0x276   :  { %v2367_v36 = vpop.f32.mrf.mxu0  ;;  %v997_v56 = vrot.slane %v996_v47, 2 }
 0x277   :  { %v595_v38 = vpack.c.bf16 %v2367_v36, %v2366_v28  ;;  %753 = vmatmul.mubr.bf16.gmra.mxu1 %v607_v13  ;;  %v1002_v39 = vunpack.i.l.bf16 %v608_v34  ;;  %v1003_v43 = vunpack.i.h.bf16 %v608_v34  ;;  %v1014_v44 = vmax.f32 %v1012_v35, %v1013_v37 }
 0x278   :  { %v562_v41 = vpop.f32.mrf.mxu0  ;;  %762 = vmatprep.mubr.bf16.mxu1 %v2536_v45  ;;  %v987_v54 = vrot.slane %v986_v40, 2  ;;  %v998_v6 = vmax.f32 %v996_v47, %v997_v56 }
 0x279   :  { %v603_v46 = vadd.bf16 %v595_v38, %v2856_v5  ;;  %v594_v48 = vpack.c.bf16 %v562_v41, %v559_v32  ;;  %v1004_v49 = vmax.f32 %v1002_v39, %v1003_v43  ;;  %v1015_v50 = vrot.slane %v1014_v44, 4 }
 0x27a   :  { %v988_v2 = vmax.f32 %v986_v40, %v987_v54  ;;  %v999_v21 = vrot.slane %v998_v6, 1 }
 0x27b   :  { %v602_v51 = vadd.bf16 %v594_v48, %v2856_v5  ;;  %v2370_v52 = vpop.f32.mrf.mxu0  ;;  %v2871_v53 = vmax.bf16 %v2536_v45, %v603_v46  ;;  %v1005_v55 = vrot.slane %v1004_v49, 4  ;;  %v1016_v61 = vmax.f32 %v1014_v44, %v1015_v50 }
 0x27c   :  { %v989_v15 = vrot.slane %v988_v2, 1  ;;  %v1000_v35 = vmax.f32 %v998_v6, %v999_v21  ;;  %v2460_v21 = vld [vmem:[%s3218_s7 + $0x14] ss:$8 sps:$4 sm:$0xff]  }
 0x27d   :  { %v575_v57 = vpop.f32.mrf.mxu0  ;;  %v610_v58 = vmax.bf16 %v2536_v45, %v602_v51  ;;  %v1032_v59 = vunpack.i.l.bf16 %v2871_v53  ;;  %v1006_v60 = vmax.f32 %v1004_v49, %v1005_v55  ;;  %v1033_v62 = vunpack.i.h.bf16 %v2871_v53 }
 0x27e   :  { %v1017_v12 = vrot.slane %v1016_v61, 2  ;;  %v990_v29 = vmax.f32 %v988_v2, %v989_v15  ;;  %v1001_v47 = vpack.i.bf16 %v1000_v35, %v1000_v35  ;;  %v2481_v35 = vld [vmem:[%s3219_s5 + $0x24] ss:$8 sps:$4 sm:$0xff]  }
 0x27f   :  { %v2371_v63 = vpop.f32.mrf.mxu0  ;;  %763 = vmatmul.mubr.bf16.gmra.mxu1 %v608_v34  ;;  %v1022_v0 = vunpack.i.l.bf16 %v610_v58  ;;  %v1023_v1 = vunpack.i.h.bf16 %v610_v58  ;;  %v1007_v4 = vrot.slane %v1006_v60, 2  ;;  %v1034_v26 = vmax.f32 %v1032_v59, %v1033_v62 }
 0x280   :  { %v597_v3 = vpack.c.bf16 %v2371_v63, %v2370_v52  ;;  %772 = vmatprep.mubr.bf16.mxu1 %v2536_v45  ;;  %v1018_v24 = vmax.f32 %v1016_v61, %v1017_v12  ;;  %v991_v41 = vpack.i.bf16 %v990_v29, %v990_v29  ;;  %v1279_v59 = vunpack.c.l.b16 %v1001_v47  ;;  %v2472_v29 = vld [vmem:[%s3219_s5 + $0x54] ss:$8 sps:$4 sm:$0xff]   ;;  %v2494_v47 = vld [vmem:[%s3219_s5 + $0xd0] ss:$8 sps:$4 sm:$0xff]  }
 0x281   :  { %v578_v7 = vpop.f32.mrf.mxu0  ;;  %v1024_v8 = vmax.f32 %v1022_v0, %v1023_v1  ;;  %v1008_v10 = vmax.f32 %v1006_v60, %v1007_v4  ;;  %v1035_v14 = vrot.slane %v1034_v26, 4 }
 0x282   :  { %v605_v9 = vadd.bf16 %v597_v3, %v2856_v5  ;;  %v596_v11 = vpack.c.bf16 %v578_v7, %v575_v57  ;;  %v1019_v37 = vrot.slane %v1018_v24, 1  ;;  %v1278_v52 = vunpack.c.l.b16 %v991_v41  ;;  %v2490_v41 = vld [vmem:[%s3219_s5 + $0xf4] ss:$8 sps:$4 sm:$0xff]  }
 0x283   :  { %v1025_v13 = vrot.slane %v1024_v8, 4  ;;  %v1009_v18 = vrot.slane %v1008_v10, 1  ;;  %v1036_v20 = vmax.f32 %v1034_v26, %v1035_v14 }
 0x284   :  { %v2879_v16 = vmax.bf16 %v2536_v45, %v605_v9  ;;  %v604_v17 = vadd.bf16 %v596_v11, %v2856_v5  ;;  %v1020_v49 = vmax.f32 %v1018_v24, %v1019_v37  ;;  %v1287_v0 = vsel %vm1286_vm3, %v1279_v59, %v1278_v52  ;;  %v2461_v24 = vld [vmem:[%s3218_s7] ss:$8 sps:$4 sm:$0xff]   ;;  %v2484_v37 = vld [vmem:[%s3219_s5 + $0x14] ss:$8 sps:$4 sm:$0xff]   ;;  %v2505_v52 = vld [vmem:[%s3219_s5 + $0xa4] ss:$8 sps:$4 sm:$0xff]  }
 0x285   :  { %v1026_v19 = vmax.f32 %v1024_v8, %v1025_v13  ;;  %v1037_v27 = vrot.slane %v1036_v20, 2  ;;  %v1010_v32 = vmax.f32 %v1008_v10, %v1009_v18  ;;  %v2509_v59 = vld [vmem:[%s3219_s5 + $0x80] ss:$8 sps:$4 sm:$0xff]  }
 0x286   :  { %v1052_v22 = vunpack.i.l.bf16 %v2879_v16  ;;  %v1053_v23 = vunpack.i.h.bf16 %v2879_v16  ;;  %v612_v28 = vmax.bf16 %v2536_v45, %v604_v17  ;;  %v1021_v61 = vpack.i.bf16 %v1020_v49, %v1020_v49  ;;  %v2497_v49 = vld [vmem:[%s3219_s5 + $0xc0] ss:$8 sps:$4 sm:$0xff]  }
 0x287   :  { %773 = vmatmul.mubr.bf16.gmra.mxu1 %v609_v30  ;;  %v1027_v25 = vrot.slane %v1026_v19, 2  ;;  %v1038_v38 = vmax.f32 %v1036_v20, %v1037_v27  ;;  %v1011_v43 = vpack.i.bf16 %v1010_v32, %v1010_v32  ;;  %v2455_v20 = vld [vmem:[%s3218_s7 + $0x20] ss:$8 sps:$4 sm:$0xff]   ;;  %v2464_v27 = vld [vmem:[%s3219_s5 + $0x70] ss:$8 sps:$4 sm:$0xff]  }
 0x288   :  { %v1054_v31 = vmax.f32 %v1052_v22, %v1053_v23  ;;  %782 = vmatprep.mubr.bf16.mxu1 %v2536_v45  ;;  %v1042_v33 = vunpack.i.l.bf16 %v612_v28  ;;  %v1043_v34 = vunpack.i.h.bf16 %v612_v28  ;;  %v1281_v4 = vunpack.c.l.b16 %v1021_v61  ;;  %v2458_v22 = vld [vmem:[%s3218_s7 + $0x10] ss:$8 sps:$4 sm:$0xff]   ;;  %v2463_v23 = vld [vmem:[%s3218_s7 + $0x4] ss:$8 sps:$4 sm:$0xff]  }
 0x289   :  { %v1028_v5 = vmax.f32 %v1026_v19, %v1027_v25  ;;  %v1039_v50 = vrot.slane %v1038_v38, 1  ;;  %v1280_v55 = vunpack.c.l.b16 %v1011_v43  ;;  %v2457_v19 = vld [vmem:[%s3218_s7 + $0x24] ss:$8 sps:$4 sm:$0xff]   ;;  %v1705_v25 = vpack.c.b16 %v2782_v42, %v2782_v42  ;;  %v2467_v42 = vld [vmem:[%s3219_s5 + $0x60] ss:$8 sps:$4 sm:$0xff]   ;;  %v2513_v61 = vld [vmem:[%s3220_s8 + $0x38] sm:$0xff]  }
 0x28a   :  { %v1055_v36 = vrot.slane %v1054_v31, 4  ;;  %v1044_v40 = vmax.f32 %v1042_v33, %v1043_v34  ;;  %v2475_v32 = vld [vmem:[%s3219_s5 + $0x44] ss:$8 sps:$4 sm:$0xff]   ;;  %v2478_v33 = vld [vmem:[%s3219_s5 + $0x34] ss:$8 sps:$4 sm:$0xff]  }
 0x28b   :  { %v1029_v39 = vrot.slane %v1028_v5, 1  ;;  %v1040_v62 = vmax.f32 %v1038_v38, %v1039_v50  ;;  %v1289_v2 = vsel %vm1288_vm4, %v1280_v55, %v1287_v0  ;;  %v2476_v34 = vld [vmem:[%s3219_s5 + $0x30] ss:$8 sps:$4 sm:$0xff]   ;;  %v2493_v43 = vld [vmem:[%s3219_s5 + $0xe4] ss:$8 sps:$4 sm:$0xff]  }
 0x28c   :  { %v1056_v30 = vmax.f32 %v1054_v31, %v1055_v36  ;;  %v1045_v46 = vrot.slane %v1044_v40, 4  ;;  %v1291_v8 = vsel %vm1290_vm5, %v1281_v4, %v1289_v2  ;;  %v2470_v31 = vld [vmem:[%s3219_s5 + $0x50] ss:$8 sps:$4 sm:$0xff]   ;;  %v2479_v36 = vld [vmem:[%s3219_s5 + $0x20] ss:$8 sps:$4 sm:$0xff]   ;;  %v52_v4 = vlaneseq }
 0x28d   :  { %v1030_v44 = vmax.f32 %v1028_v5, %v1029_v39  ;;  %v1041_v26 = vpack.i.bf16 %v1040_v62, %v1040_v62  ;;  %v2473_v5 = vld [vmem:[%s3219_s5 + $0x40] ss:$8 sps:$4 sm:$0xff]   ;;  %v2482_v38 = vld [vmem:[%s3219_s5 + $0x10] ss:$8 sps:$4 sm:$0xff]   ;;  %v2487_v39 = vld [vmem:[%s3219_s5 + $0x4] ss:$8 sps:$4 sm:$0xff]  }
 0x28e   :  { %v1057_v48 = vrot.slane %v1056_v30, 2  ;;  %v1046_v51 = vmax.f32 %v1044_v40, %v1045_v46  ;;  %v2485_v40 = vld [vmem:[%s3219_s5] ss:$8 sps:$4 sm:$0xff]   ;;  %v2496_v46 = vld [vmem:[%s3219_s5 + $0xd4] ss:$8 sps:$4 sm:$0xff]  }
 0x28f   :  { %783 = vmatmul.mubr.bf16.gmra.mxu1 %v610_v58  ;;  %v1031_v56 = vpack.i.bf16 %v1030_v44, %v1030_v44  ;;  %v1283_v11 = vunpack.c.l.b16 %v1041_v26  ;;  %v2491_v44 = vld [vmem:[%s3219_s5 + $0xe0] ss:$8 sps:$4 sm:$0xff]   ;;  %v2502_v50 = vld [vmem:[%s3219_s5 + $0xb4] ss:$8 sps:$4 sm:$0xff]   ;;  %v2506_v55 = vld [vmem:[%s3219_s5 + $0x90] ss:$8 sps:$4 sm:$0xff]  }
 0x290   :  { %v1058_v54 = vmax.f32 %v1056_v30, %v1057_v48  ;;  %792 = vmatprep.mubr.bf16.mxu1 %v2536_v45  ;;  %v1047_v57 = vrot.slane %v1046_v51, 2  ;;  %v2488_v30 = vld [vmem:[%s3219_s5 + $0xf0] ss:$8 sps:$4 sm:$0xff]   ;;  %v2499_v48 = vld [vmem:[%s3219_s5 + $0xc4] ss:$8 sps:$4 sm:$0xff]  }
 0x291   :  { %v1282_v3 = vunpack.c.l.b16 %v1031_v56  ;;  %v2508_v56 = vld [vmem:[%s3219_s5 + $0x94] ss:$8 sps:$4 sm:$0xff]   ;;  %v2516_v0 = vld [vmem:[%s3220_s8 + $0x68] sm:$0xff]   ;;  %v2518_v2 = vld [vmem:[%s3220_s8 + $0x60] sm:$0xff]  }
 0x292   :  { %v1059_v60 = vrot.slane %v1058_v54, 1  ;;  %v1048_v63 = vmax.f32 %v1046_v51, %v1047_v57  ;;  %v2500_v51 = vld [vmem:[%s3219_s5 + $0xb0] ss:$8 sps:$4 sm:$0xff]   ;;  %v2511_v57 = vld [vmem:[%s3219_s5 + $0x84] ss:$8 sps:$4 sm:$0xff]  }
 0x293   :  { %v1293_v10 = vsel %vm1292_vm6, %v1282_v3, %v1291_v8  ;;  %v2514_v62 = vld [vmem:[%s3220_s8 + $0x70] sm:$0xff]   ;;  %v2519_v3 = vld [vmem:[%s3220_s8 + $0x20] sm:$0xff]   ;;  %v2521_v26 = vld [vmem:[%s3220_s8 + $0x18] sm:$0xff]  }
 0x294   :  { %v1060_v1 = vmax.f32 %v1058_v54, %v1059_v60  ;;  %v1049_v58 = vrot.slane %v1048_v63, 1  ;;  %v1295_v14 = vsel %vm1294_vm7, %v1283_v11, %v1293_v10  ;;  %v2503_v54 = vld [vmem:[%s3219_s5 + $0xa0] ss:$8 sps:$4 sm:$0xff]   ;;  %v2512_v60 = vld [vmem:[%s3220_s8 + $0x78] sm:$0xff]  }
 0x295   :  { %v2110_v8 = vld [vmem:[%s3215_s11 + $0x3] ss:$8 sm:$0x3] }
 0x296   :  { %v1050_v6 = vmax.f32 %v1048_v63, %v1049_v58  ;;  %v1061_v7 = vpack.i.bf16 %v1060_v1, %v1060_v1  ;;  %v2515_v63 = vld [vmem:[%s3220_s8 + $0x30] sm:$0xff]   ;;  %v2517_v1 = vld [vmem:[%s3220_s8 + $0x28] sm:$0xff]   ;;  %v2520_v58 = vld [vmem:[%s3220_s8 + $0x58] sm:$0xff]  }
 0x297   :  { %793 = vmatmul.mubr.bf16.gmra.mxu1 %v2871_v53  ;;  %v2452_v53 = vld [vmem:[%s3218_s7 + $0x30] ss:$8 sps:$4 sm:$0xff]  }
 0x298   :  { %802 = vmatprep.mubr.bf16.mxu1 %v2536_v45  ;;  %v1051_v9 = vpack.i.bf16 %v1050_v6, %v1050_v6  ;;  %v1285_v13 = vunpack.c.l.b16 %v1061_v7  ;;  %v3049_v6 = vshrl.u32 %v52_v4, 7 }
 0x29a   :  { %v1284_v12 = vunpack.c.l.b16 %v1051_v9  ;;  %v3052_v7 = vsub.s32 0, %v3049_v6  ;;  %v58_v10 = vsub.s32 1, %v3049_v6 }
 0x29c   :  { %v1297_v15 = vsel %vm1296_vm8, %v1284_v12, %v1295_v14  ;;  %v55_v9 = vrot.slane %v2110_v8, %v3052_v7  ;;  %v59_v12 = vrot.slane %v2110_v8, %v58_v10 }
 0x29d   :  { %v1299_v17 = vsel %vm1298_vm9, %v1285_v13, %v1297_v15 }
 0x29e   :  { %v1300_v18 = vpack.c.b16 %v1299_v17, %v1299_v17  ;;  %v62_v11 = vpack.c.bf16 %v55_v9, %v55_v9  ;;  %v63_v15 = vpack.c.bf16 %v59_v12, %v59_v12 }
 0x29f   :  { %803 = vmatmul.mubr.bf16.gmra.mxu1 %v612_v28  ;;  %v2469_v28 = vld [vmem:[%s3219_s5 + $0x64] ss:$8 sps:$4 sm:$0xff]  }
 0x2a0   :  { %812 = vmatprep.mubr.bf16.mxu1 %v2536_v45  ;;  %1415 = vmatmul.mubr.bf16.vlgmr.msra.gmra.mxu0 %v1300_v18  ;;  %v840_v13 = vpack.i.b16 %v62_v11, %v62_v11 }
 0x2a1   :  { %1758 = vmatpush1.bf16.msra.mxu0 %v2452_v53  ;;  %1781 = vmatprep.mubr.bf16.mxu0 %v2536_v45 }
 0x2a2   :  { %1759 = vmatprep.subr.bf16.mxu0 %v2457_v19  ;;  %v3062_v17 = vrot.slane %v840_v13, %v3052_v7  ;;  %v847_v19 = vpack.i.b16 %v63_v15, %v63_v15 }
 0x2a5   :  { %1760 = vmatpush1.bf16.msra.mxu0 %v2455_v20 }
 0x2a6   :  { %1761 = vmatprep.subr.bf16.mxu0 %v2460_v21 }
 0x2a7   :  { %813 = vmatmul.mubr.bf16.gmra.mxu1 %v2879_v16  ;;  %v2466_v16 = vld [vmem:[%s3219_s5 + $0x74] ss:$8 sps:$4 sm:$0xff]  }
 0x2a8   :  { %1633 = vmatprep.subr.bf16.mxu1 %v2466_v16 }
 0x2a9   :  { %1762 = vmatpush1.bf16.msra.mxu0 %v2458_v22  ;;  %1634 = vmatpush1.bf16.msra.mxu1 %v2464_v27 }
 0x2aa   :  { %1763 = vmatprep.subr.bf16.mxu0 %v2463_v23  ;;  %1635 = vmatprep.subr.bf16.mxu1 %v2469_v28 }
 0x2ad   :  { %1764 = vmatpush1.bf16.msra.mxu0 %v2461_v24  ;;  %1636 = vmatpush1.bf16.msra.mxu1 %v2467_v42  ;;  %v3066_v24 = vrot.slane %v847_v19, %v3052_v7 }
 0x2ae   :  { %1637 = vmatprep.subr.bf16.mxu1 %v2472_v29  ;;  %2275 = vmatprep.subr.bf16.mxu0 %v2512_v60 }
 0x2b0   :  { %2216 = vmatmul.mubr.msk.bf16.vlgmr.msra.gmra.mxu0 %vm291_vm2, %v1705_v25 }
 0x2b1   :  { %1638 = vmatpush1.bf16.msra.mxu1 %v2470_v31  ;;  %2276 = vmatpush3.bf16.msra.mxu0 %v2513_v61 }
 0x2b2   :  { %1639 = vmatprep.subr.bf16.mxu1 %v2475_v32  ;;  %2277 = vmatprep.subr.bf16.mxu0 %v2514_v62 }
 0x2b5   :  { %1640 = vmatpush1.bf16.msra.mxu1 %v2473_v5  ;;  %2278 = vmatpush3.bf16.msra.mxu0 %v2515_v63 }
 0x2b6   :  { %1641 = vmatprep.subr.bf16.mxu1 %v2478_v33  ;;  %2279 = vmatprep.subr.bf16.mxu0 %v2516_v0 }
 0x2b9   :  { %1642 = vmatpush1.bf16.msra.mxu1 %v2476_v34  ;;  %2280 = vmatpush3.bf16.msra.mxu0 %v2517_v1 }
 0x2ba   :  { %1643 = vmatprep.subr.bf16.mxu1 %v2481_v35  ;;  %2281 = vmatprep.subr.bf16.mxu0 %v2518_v2 }
 0x2bd   :  { %1644 = vmatpush1.bf16.msra.mxu1 %v2479_v36  ;;  %2282 = vmatpush3.bf16.msra.mxu0 %v2519_v3 }
 0x2be   :  { %1645 = vmatprep.subr.bf16.mxu1 %v2484_v37  ;;  %2283 = vmatprep.subr.bf16.mxu0 %v2520_v58 }
 0x2c1   :  { %1646 = vmatpush1.bf16.msra.mxu1 %v2482_v38  ;;  %2284 = vmatpush3.bf16.msra.mxu0 %v2521_v26 }
 0x2c2   :  { %1647 = vmatprep.subr.bf16.mxu1 %v2487_v39 }
 0x2c5   :  { %1648 = vmatpush1.bf16.msra.mxu1 %v2485_v40 }
 0x2c6   :  { %1649 = vmatprep.subr.bf16.mxu1 %v2490_v41 }
 0x2c9   :  { %1650 = vmatpush2.bf16.msra.mxu1 %v2488_v30 }
 0x2ca   :  { %1651 = vmatprep.subr.bf16.mxu1 %v2493_v43 }
 0x2cd   :  { %1652 = vmatpush2.bf16.msra.mxu1 %v2491_v44 }
 0x2ce   :  { %1653 = vmatprep.subr.bf16.mxu1 %v2496_v46 }
 0x2d1   :  { %1654 = vmatpush2.bf16.msra.mxu1 %v2494_v47 }
 0x2d2   :  { %1655 = vmatprep.subr.bf16.mxu1 %v2499_v48 }
 0x2d5   :  { %1656 = vmatpush2.bf16.msra.mxu1 %v2497_v49 }
 0x2d6   :  { %1657 = vmatprep.subr.bf16.mxu1 %v2502_v50 }
 0x2d9   :  { %1658 = vmatpush2.bf16.msra.mxu1 %v2500_v51 }
 0x2da   :  { %1659 = vmatprep.subr.bf16.mxu1 %v2505_v52 }
 0x2dd   :  { %1660 = vmatpush2.bf16.msra.mxu1 %v2503_v54 }
 0x2de   :  { %1661 = vmatprep.subr.bf16.mxu1 %v2508_v56 }
 0x2e1   :  { %1662 = vmatpush2.bf16.msra.mxu1 %v2506_v55 }
 0x2e2   :  { %1663 = vmatprep.subr.bf16.mxu1 %v2511_v57 }
 0x2e5   :  { %1664 = vmatpush2.bf16.msra.mxu1 %v2509_v59 }
 0x32f   :  { %v744_v14 = vpop.f32.mrf.mxu1 }
 0x331   :  { %v746_v53 = vpop.f32.mrf.mxu1 }
 0x333   :  { %v748_v18 = vpop.f32.mrf.mxu1 }
 0x334   :  { %v823_v20 = vpack.c.bf16 %v748_v18, %v744_v14 }
 0x335   :  { %v750_v21 = vpop.f32.mrf.mxu1 }
 0x336   :  { %v853_v22 = vadd.bf16 %v3062_v17, %v823_v20  ;;  %v824_v23 = vpack.c.bf16 %v750_v21, %v746_v53 }
 0x337   :  { %v754_v25 = vpop.f32.mrf.mxu1 }
 0x338   :  { %v869_v16 = vmax.bf16 %v2536_v45, %v853_v22  ;;  %v854_v28 = vadd.bf16 %v3066_v24, %v824_v23 }
 0x339   :  { %v756_v27 = vpop.f32.mrf.mxu1 }
 0x33a   :  { %v1062_v31 = vunpack.i.l.bf16 %v869_v16  ;;  %v1063_v32 = vunpack.i.h.bf16 %v869_v16  ;;  %v870_v33 = vmax.bf16 %v2536_v45, %v854_v28 }
 0x33b   :  { %v758_v42 = vpop.f32.mrf.mxu1 }
 0x33c   :  { %v825_v29 = vpack.c.bf16 %v758_v42, %v754_v25  ;;  %v1064_v36 = vmax.f32 %v1062_v31, %v1063_v32  ;;  %v1072_v39 = vunpack.i.l.bf16 %v870_v33  ;;  %v1073_v40 = vunpack.i.h.bf16 %v870_v33 }
 0x33d   :  { %v760_v5 = vpop.f32.mrf.mxu1 }
 0x33e   :  { %v855_v34 = vadd.bf16 %v3062_v17, %v825_v29  ;;  %v826_v37 = vpack.c.bf16 %v760_v5, %v756_v27  ;;  %v1065_v43 = vrot.slane %v1064_v36, 4  ;;  %v1074_v47 = vmax.f32 %v1072_v39, %v1073_v40 }
 0x33f   :  { %v764_v35 = vpop.f32.mrf.mxu1 }
 0x340   :  { %v871_v41 = vmax.bf16 %v2536_v45, %v855_v34  ;;  %v856_v44 = vadd.bf16 %v3066_v24, %v826_v37  ;;  %v1066_v51 = vmax.f32 %v1064_v36, %v1065_v43  ;;  %v1075_v56 = vrot.slane %v1074_v47, 4 }
 0x341   :  { %v766_v38 = vpop.f32.mrf.mxu1 }
 0x342   :  { %v1082_v48 = vunpack.i.l.bf16 %v871_v41  ;;  %v1083_v49 = vunpack.i.h.bf16 %v871_v41  ;;  %v872_v52 = vmax.bf16 %v2536_v45, %v856_v44  ;;  %v1067_v62 = vrot.slane %v1066_v51, 2 }
 0x343   :  { %v768_v30 = vpop.f32.mrf.mxu1  ;;  %v1076_v58 = vmax.f32 %v1074_v47, %v1075_v56 }
 0x344   :  { %v827_v55 = vpack.c.bf16 %v768_v30, %v764_v35  ;;  %v1084_v57 = vmax.f32 %v1082_v48, %v1083_v49  ;;  %v1092_v63 = vunpack.i.l.bf16 %v872_v52  ;;  %v1093_v0 = vunpack.i.h.bf16 %v872_v52 }
 0x345   :  { %v770_v46 = vpop.f32.mrf.mxu1  ;;  %v1068_v11 = vmax.f32 %v1066_v51, %v1067_v62  ;;  %v1077_v53 = vrot.slane %v1076_v58, 2 }
 0x346   :  { %v828_v59 = vpack.c.bf16 %v770_v46, %v766_v38  ;;  %v857_v2 = vadd.bf16 %v3062_v17, %v827_v55  ;;  %v1085_v4 = vrot.slane %v1084_v57, 4  ;;  %v1094_v12 = vmax.f32 %v1092_v63, %v1093_v0 }
 0x347   :  { %v774_v50 = vpop.f32.mrf.mxu1  ;;  %v1069_v22 = vrot.slane %v1068_v11, 1  ;;  %v1078_v31 = vmax.f32 %v1076_v58, %v1077_v53 }
 0x348   :  { %v858_v26 = vadd.bf16 %v3066_v24, %v828_v59  ;;  %v873_v14 = vmax.bf16 %v2536_v45, %v857_v2  ;;  %v1086_v18 = vmax.f32 %v1084_v57, %v1085_v4  ;;  %v1095_v23 = vrot.slane %v1094_v12, 4 }
 0x349   :  { %v776_v54 = vpop.f32.mrf.mxu1  ;;  %v1070_v39 = vmax.f32 %v1068_v11, %v1069_v22  ;;  %v1079_v48 = vrot.slane %v1078_v31, 1 }
 0x34a   :  { %v874_v19 = vmax.bf16 %v2536_v45, %v858_v26  ;;  %v1102_v27 = vunpack.i.l.bf16 %v873_v14  ;;  %v1103_v28 = vunpack.i.h.bf16 %v873_v14  ;;  %v1087_v32 = vrot.slane %v1086_v18, 2 }
 0x34b   :  { %v778_v60 = vpop.f32.mrf.mxu1  ;;  %v1096_v40 = vmax.f32 %v1094_v12, %v1095_v23  ;;  %v1071_v56 = vpack.i.bf16 %v1070_v39, %v1070_v39  ;;  %v1080_v2 = vmax.f32 %v1078_v31, %v1079_v48 }
 0x34c   :  { %v829_v61 = vpack.c.bf16 %v778_v60, %v774_v50  ;;  %v1112_v5 = vunpack.i.l.bf16 %v874_v19  ;;  %v1113_v35 = vunpack.i.h.bf16 %v874_v19  ;;  %v1104_v43 = vmax.f32 %v1102_v27, %v1103_v28 }
 0x34d   :  { %v780_v1 = vpop.f32.mrf.mxu1  ;;  %v1088_v52 = vmax.f32 %v1086_v18, %v1087_v32  ;;  %v1097_v62 = vrot.slane %v1096_v40, 2  ;;  %v3089_v12 = vunpack.c.l.b16 %v1071_v56  ;;  %v1081_v22 = vpack.i.bf16 %v1080_v2, %v1080_v2 }
 0x34e   :  { %v830_v3 = vpack.c.bf16 %v780_v1, %v776_v54  ;;  %v859_v9 = vadd.bf16 %v3062_v17, %v829_v61  ;;  %v1114_v54 = vmax.f32 %v1112_v5, %v1113_v35  ;;  %v1105_v63 = vrot.slane %v1104_v43, 4 }
 0x34f   :  { %v784_v8 = vpop.f32.mrf.mxu1  ;;  %v1089_v26 = vrot.slane %v1088_v52, 1  ;;  %v1098_v18 = vmax.f32 %v1096_v40, %v1097_v62 }
 0x350   :  { %v860_v15 = vadd.bf16 %v3066_v24, %v830_v3  ;;  %v875_v21 = vmax.bf16 %v2536_v45, %v859_v9  ;;  %v1106_v19 = vmax.f32 %v1104_v43, %v1105_v63 }
 0x351   :  { %v786_v13 = vpop.f32.mrf.mxu1 }
 0x352   :  { %v876_v42 = vmax.bf16 %v2536_v45, %v860_v15  ;;  %v1122_v36 = vunpack.i.l.bf16 %v875_v21  ;;  %v1123_v37 = vunpack.i.h.bf16 %v875_v21  ;;  %v1107_v39 = vrot.slane %v1106_v19, 2 }
 0x353   :  { %v788_v20 = vpop.f32.mrf.mxu1 }
 0x354   :  { %v831_v25 = vpack.c.bf16 %v788_v20, %v784_v8  ;;  %v1132_v44 = vunpack.i.l.bf16 %v876_v42  ;;  %v1133_v46 = vunpack.i.h.bf16 %v876_v42  ;;  %v1124_v55 = vmax.f32 %v1122_v36, %v1123_v37 }
 0x355   :  { %v790_v16 = vpop.f32.mrf.mxu1  ;;  %v1115_v8 = vrot.slane %v1114_v54, 4  ;;  %v3097_v42 = vmax.f32 %v1088_v52, %v1089_v26  ;;  %v1108_v62 = vmax.f32 %v1106_v19, %v1107_v39 }
 0x356   :  { %v832_v29 = vpack.c.bf16 %v790_v16, %v786_v13  ;;  %v861_v33 = vadd.bf16 %v3062_v17, %v831_v25  ;;  %v1134_v0 = vmax.f32 %v1132_v44, %v1133_v46  ;;  %v1125_v9 = vrot.slane %v1124_v55, 4 }
 0x357   :  { %v794_v34 = vpop.f32.mrf.mxu1 }
 0x358   :  { %v862_v38 = vadd.bf16 %v3066_v24, %v832_v29  ;;  %v877_v41 = vmax.bf16 %v2536_v45, %v861_v33  ;;  %v1135_v20 = vrot.slane %v1134_v0, 4  ;;  %v1116_v29 = vmax.f32 %v1114_v54, %v1115_v8 }
 0x359   :  { %v796_v30 = vpop.f32.mrf.mxu1  ;;  %v1126_v31 = vmax.f32 %v1124_v55, %v1125_v9 }
 0x35a   :  { %v878_v47 = vmax.bf16 %v2536_v45, %v862_v38  ;;  %v1142_v49 = vunpack.i.l.bf16 %v877_v41  ;;  %v1143_v50 = vunpack.i.h.bf16 %v877_v41  ;;  %v1099_v38 = vrot.slane %v1098_v18, 1 }
 0x35b   :  { %v798_v51 = vpop.f32.mrf.mxu1  ;;  %v1136_v40 = vmax.f32 %v1134_v0, %v1135_v20 }
 0x35c   :  { %v1152_v57 = vunpack.i.l.bf16 %v878_v47  ;;  %v1153_v59 = vunpack.i.h.bf16 %v878_v47  ;;  %v833_v60 = vpack.c.bf16 %v798_v51, %v794_v34  ;;  %v1144_v3 = vmax.f32 %v1142_v49, %v1143_v50 }
 0x35d   :  { %v800_v61 = vpop.f32.mrf.mxu1  ;;  %v3100_v49 = vunpack.c.l.b16 %v1081_v22  ;;  %v1117_v50 = vrot.slane %v1116_v29, 2  ;;  %v1127_v51 = vrot.slane %v1126_v31, 2  ;;  %v1137_v0 = vrot.slane %v1136_v40, 2 }
 0x35e   :  { %v834_v1 = vpack.c.bf16 %v800_v61, %v796_v30  ;;  %v863_v58 = vadd.bf16 %v3062_v17, %v833_v60  ;;  %v1154_v13 = vmax.f32 %v1152_v57, %v1153_v59  ;;  %v1145_v23 = vrot.slane %v1144_v3, 4 }
 0x35f   :  { %v804_v4 = vpop.f32.mrf.mxu1  ;;  %v1091_v60 = vpack.i.bf16 %v3097_v42, %v3097_v42  ;;  %v3106_v61 = vmax.f32 %v1098_v18, %v1099_v38 }
 0x360   :  { %v864_v11 = vadd.bf16 %v3066_v24, %v834_v1  ;;  %v879_v14 = vmax.bf16 %v2536_v45, %v863_v58  ;;  %v3092_v15 = vpop.f32.mrf.mxu0  ;;  %v1155_v5 = vrot.slane %v1154_v13, 4  ;;  %v1146_v30 = vmax.f32 %v1144_v3, %v1145_v23 }
 0x361   :  { %v806_v53 = vpop.f32.mrf.mxu1  ;;  %v1109_v23 = vrot.slane %v1108_v62, 1 }
 0x362   :  { %v880_v21 = vmax.bf16 %v2536_v45, %v864_v11  ;;  %v1162_v25 = vunpack.i.l.bf16 %v879_v14  ;;  %v1163_v16 = vunpack.i.h.bf16 %v879_v14  ;;  %v3095_v27 = vpop.f32.mrf.mxu0  ;;  %v1156_v54 = vmax.f32 %v1154_v13, %v1155_v5 }
 0x363   :  { %v808_v28 = vpop.f32.mrf.mxu1  ;;  %v1147_v1 = vrot.slane %v1146_v30, 2  ;;  %v1128_v11 = vmax.f32 %v1126_v31, %v1127_v51  ;;  %v1110_v51 = vmax.f32 %v1108_v62, %v1109_v23  ;;  %v1101_v62 = vpack.i.bf16 %v3106_v61, %v3106_v61 }
 0x364   :  { %v1172_v32 = vunpack.i.l.bf16 %v880_v21  ;;  %v1164_v33 = vmax.f32 %v1162_v25, %v1163_v16  ;;  %v1173_v34 = vunpack.i.h.bf16 %v880_v21  ;;  %v835_v35 = vpack.c.bf16 %v808_v28, %v804_v4  ;;  %v1420_v36 = vpop.f32.mrf.mxu0 }
 0x365   :  { %v810_v37 = vpop.f32.mrf.mxu1  ;;  %v1118_v4 = vmax.f32 %v1116_v29, %v1117_v50  ;;  %v1157_v13 = vrot.slane %v1156_v54, 2  ;;  %v1138_v25 = vmax.f32 %v1136_v40, %v1137_v0  ;;  %v1148_v16 = vmax.f32 %v1146_v30, %v1147_v1 }
 0x366   :  { %v836_v41 = vpack.c.bf16 %v810_v37, %v806_v53  ;;  %v1165_v43 = vrot.slane %v1164_v33, 4  ;;  %v1174_v44 = vmax.f32 %v1172_v32, %v1173_v34  ;;  %v865_v46 = vadd.bf16 %v3062_v17, %v835_v35  ;;  %v1421_v47 = vpop.f32.mrf.mxu0 }
 0x367   :  { %v814_v48 = vpop.f32.mrf.mxu1  ;;  %v1119_v32 = vrot.slane %v1118_v4, 1  ;;  %v1129_v34 = vrot.slane %v1128_v11, 1  ;;  %v1158_v31 = vmax.f32 %v1156_v54, %v1157_v13  ;;  %v1139_v30 = vrot.slane %v1138_v25, 1 }
 0x368   :  { %v866_v52 = vadd.bf16 %v3066_v24, %v836_v41  ;;  %v1166_v55 = vmax.f32 %v1164_v33, %v1165_v43  ;;  %v1175_v56 = vrot.slane %v1174_v44, 4  ;;  %v881_v57 = vmax.bf16 %v2536_v45, %v865_v46 }
 0x369   :  { %v816_v59 = vpop.f32.mrf.mxu1  ;;  %v1149_v43 = vrot.slane %v1148_v16, 1  ;;  %v1120_v1 = vmax.f32 %v1118_v4, %v1119_v32 }
 0x36a   :  { %v882_v63 = vmax.bf16 %v2536_v45, %v866_v52  ;;  %v1176_v2 = vmax.f32 %v1174_v44, %v1175_v56  ;;  %v1182_v3 = vunpack.i.l.bf16 %v881_v57  ;;  %v1183_v26 = vunpack.i.h.bf16 %v881_v57 }
 0x36b   :  { %v818_v58 = vpop.f32.mrf.mxu1  ;;  %v1167_v14 = vrot.slane %v1166_v55, 2  ;;  %v1159_v52 = vrot.slane %v1158_v31, 1 }
 0x36c   :  { %v1192_v8 = vunpack.i.l.bf16 %v882_v63  ;;  %v1193_v9 = vunpack.i.h.bf16 %v882_v63  ;;  %v837_v53 = vpack.c.bf16 %v818_v58, %v814_v48  ;;  %v1177_v21 = vrot.slane %v1176_v2, 2 }
 0x36d   :  { %v820_v20 = vpop.f32.mrf.mxu1  ;;  %v1184_v18 = vmax.f32 %v1182_v3, %v1183_v26  ;;  %v1168_v35 = vmax.f32 %v1166_v55, %v1167_v14  ;;  %v1140_v3 = vmax.f32 %v1138_v25, %v1139_v30 }
 0x36e   :  { %v1194_v22 = vmax.f32 %v1192_v8, %v1193_v9  ;;  %v838_v19 = vpack.c.bf16 %v820_v20, %v816_v59  ;;  %v867_v28 = vadd.bf16 %v3062_v17, %v837_v53  ;;  %v1178_v38 = vmax.f32 %v1176_v2, %v1177_v21 }
 0x36f   :  { %v1185_v5 = vrot.slane %v1184_v18, 4  ;;  %v1169_v54 = vrot.slane %v1168_v35, 1  ;;  %v1130_v2 = vmax.f32 %v1128_v11, %v1129_v34  ;;  %v1150_v8 = vmax.f32 %v1148_v16, %v1149_v43 }
 0x370   :  { %v1195_v29 = vrot.slane %v1194_v22, 4  ;;  %v868_v33 = vadd.bf16 %v3066_v24, %v838_v19  ;;  %v883_v36 = vmax.bf16 %v2536_v45, %v867_v28  ;;  %v3112_v37 = vpop.f32.mrf.mxu0  ;;  %v1179_v57 = vrot.slane %v1178_v38, 1 }
 0x371   :  { %v1186_v39 = vmax.f32 %v1184_v18, %v1185_v5  ;;  %v1160_v53 = vmax.f32 %v1158_v31, %v1159_v52  ;;  %v1170_v20 = vmax.f32 %v1168_v35, %v1169_v54  ;;  %v1111_v18 = vpack.i.bf16 %v1110_v51, %v1110_v51 }
 0x372   :  { %v1196_v41 = vmax.f32 %v1194_v22, %v1195_v29  ;;  %v884_v40 = vmax.bf16 %v2536_v45, %v868_v33  ;;  %v1202_v17 = vunpack.i.l.bf16 %v883_v36  ;;  %v1203_v44 = vunpack.i.h.bf16 %v883_v36  ;;  %v3115_v46 = vpop.f32.mrf.mxu0 }
 0x373   :  { %v1187_v47 = vrot.slane %v1186_v39, 2  ;;  %v1180_v23 = vmax.f32 %v1178_v38, %v1179_v57  ;;  %v1121_v28 = vpack.i.bf16 %v1120_v1, %v1120_v1  ;;  %v1131_v4 = vpack.i.bf16 %v1130_v2, %v1130_v2 }
 0x374   :  { %v1197_v24 = vrot.slane %v1196_v41, 2  ;;  %v1212_v48 = vunpack.i.l.bf16 %v884_v40  ;;  %v1213_v50 = vunpack.i.h.bf16 %v884_v40  ;;  %v1204_v55 = vmax.f32 %v1202_v17, %v1203_v44  ;;  %v1787_v56 = vpop.f32.mrf.mxu0 }
 0x375   :  { %v1188_v59 = vmax.f32 %v1186_v39, %v1187_v47  ;;  %v1441_v16 = vunpack.c.l.b16 %v1091_v60  ;;  %v1141_v32 = vpack.i.bf16 %v1140_v3, %v1140_v3  ;;  %v1151_v5 = vpack.i.bf16 %v1150_v8, %v1150_v8 }
 0x376   :  { %v1198_v63 = vmax.f32 %v1196_v41, %v1197_v24  ;;  %v1214_v0 = vmax.f32 %v1212_v48, %v1213_v50  ;;  %v1205_v58 = vrot.slane %v1204_v55, 4  ;;  %v1788_v26 = vpop.f32.mrf.mxu0  ;;  %v1442_v33 = vunpack.c.l.b16 %v1101_v62 }
 0x377   :  { %v1189_v9 = vrot.slane %v1188_v59, 1  ;;  %v1161_v61 = vpack.i.bf16 %v1160_v53, %v1160_v53  ;;  %v1171_v34 = vpack.i.bf16 %v1170_v20, %v1170_v20  ;;  %v1443_v35 = vunpack.c.l.b16 %v1111_v18  ;;  %v2522_v20 = vld [vmem:[%s3220_s8 + $0x50] sm:$0xff]   ;;  %v2524_v18 = vld [vmem:[%s3220_s8 + $0x48] sm:$0xff]  }
 0x378   :  { %v1215_v13 = vrot.slane %v1214_v0, 4  ;;  %v1199_v14 = vrot.slane %v1198_v63, 1  ;;  %v1206_v21 = vmax.f32 %v1204_v55, %v1205_v58  ;;  %v1181_v39 = vpack.i.bf16 %v1180_v23, %v1180_v23  ;;  %2285 = vmatprep.subr.bf16.mxu0 %v2522_v20  ;;  %v2527_v23 = vld [vmem:[%s3220_s8] sm:$0xff]  }
 0x379   :  { %v1190_v22 = vmax.f32 %v1188_v59, %v1189_v9  ;;  %v1444_v38 = vunpack.c.l.b16 %v1121_v28  ;;  %v1445_v40 = vunpack.c.l.b16 %v1131_v4  ;;  %v1455_v17 = vsel %vm1286_vm3, %v1441_v16, %v3089_v12  ;;  %v2528_v4 = vld [vmem:[%s3221_s9 + $0x38] sm:$0xff]   ;;  %v2531_v16 = vld [vmem:[%s3221_s9 + $0x20] sm:$0xff]  }
 0x37a   :  { %v1216_v19 = vmax.f32 %v1214_v0, %v1215_v13  ;;  %v1207_v11 = vrot.slane %v1206_v21, 2  ;;  %v1200_v25 = vmax.f32 %v1198_v63, %v1199_v14  ;;  %v1446_v42 = vunpack.c.l.b16 %v1141_v32  ;;  %v2532_v32 = vld [vmem:[%s3221_s9 + $0x18] sm:$0xff]  }
 0x37b   :  { %v1191_v36 = vpack.i.bf16 %v1190_v22, %v1190_v22  ;;  %v1447_v60 = vunpack.c.l.b16 %v1151_v5  ;;  %v1449_v47 = vunpack.c.l.b16 %v1171_v34  ;;  %v1448_v48 = vunpack.c.l.b16 %v1161_v61  ;;  %v2525_v22 = vld [vmem:[%s3220_s8 + $0x8] sm:$0xff]  }
 0x37c   :  { %v1217_v29 = vrot.slane %v1216_v19, 2  ;;  %v1208_v31 = vmax.f32 %v1206_v21, %v1207_v11  ;;  %v1201_v43 = vpack.i.bf16 %v1200_v25, %v1200_v25  ;;  %v1462_v50 = vsel %vm1286_vm3, %v1442_v33, %v3100_v49  ;;  %v2523_v21 = vld [vmem:[%s3220_s8 + $0x10] sm:$0xff]   ;;  %v2530_v25 = vld [vmem:[%s3221_s9 + $0x28] sm:$0xff]  }
 0x37d   :  { %v1456_v51 = vsel %vm1288_vm4, %v1443_v35, %v1455_v17  ;;  %v1451_v52 = vunpack.c.l.b16 %v1191_v36  ;;  %v1450_v55 = vunpack.c.l.b16 %v1181_v39  ;;  %v1463_v12 = vsel %vm1288_vm4, %v1444_v38, %v1462_v50  ;;  %2286 = vmatpush3.bf16.msra.mxu0 %v2523_v21  ;;  %v2529_v11 = vld [vmem:[%s3221_s9 + $0x30] sm:$0xff]   ;;  %v2111_v5 = vld [vmem:[%s3215_s11 + $0x4] ss:$8 sm:$0x3] }
 0x37e   :  { %v1218_v41 = vmax.f32 %v1216_v19, %v1217_v29  ;;  %v1209_v30 = vrot.slane %v1208_v31, 1  ;;  %v1457_v56 = vsel %vm1290_vm5, %v1445_v40, %v1456_v51  ;;  %v1452_v59 = vunpack.c.l.b16 %v1201_v43  ;;  %2287 = vmatprep.subr.bf16.mxu0 %v2524_v18  ;;  %v2526_v19 = vld [vmem:[%s3220_s8 + $0x40] sm:$0xff]  }
 0x37f   :  { %v1464_v0 = vsel %vm1290_vm5, %v1446_v42, %v1463_v12  ;;  %v1458_v1 = vsel %vm1292_vm6, %v1447_v60, %v1457_v56  ;;  %v2537_v28 = vmov 0.0   ;;  %v70_v29 = vrot.slane %v2111_v5, %v3052_v7  ;;  %v81_v12 = vld [vmem:[%s3215_s11 + $0x6] ss:$0 sm:$0xff] }
 0x380   :  { %v1219_v44 = vrot.slane %v1218_v41, 1  ;;  %v1210_v24 = vmax.f32 %v1208_v31, %v1209_v30  ;;  %v1465_v3 = vsel %vm1292_vm6, %v1448_v48, %v1464_v0  ;;  %v1459_v49 = vsel %vm1294_vm7, %v1449_v47, %v1458_v1  ;;  %2372 = vmatprep.subr.bf16.mxu1 %v2537_v28  ;;  %v79_v48 = vld [vmem:[%s3215_s11 + $0x5] ss:$0 sm:$0xff] }
 0x381   :  { %v1466_v26 = vsel %vm1294_vm7, %v1450_v55, %v1465_v3  ;;  %v1460_v8 = vsel %vm1296_vm8, %v1451_v52, %v1459_v49  ;;  %2288 = vmatpush3.bf16.msra.mxu0 %v2525_v22  ;;  %v74_v33 = vrot.slane %v2111_v5, %v58_v10  ;;  %v77_v61 = vpack.c.bf16 %v70_v29, %v70_v29 }
 0x382   :  { %v1220_v54 = vmax.f32 %v1218_v41, %v1219_v44  ;;  %v1211_v57 = vpack.i.bf16 %v1210_v24, %v1210_v24  ;;  %v1467_v9 = vsel %vm1296_vm8, %v1452_v59, %v1466_v26  ;;  %2289 = vmatprep.subr.bf16.mxu0 %v2526_v19  ;;  %v80_v51 = vpack.c.bf16 %v79_v48, %v79_v48 }
 0x383   :  { %v78_v34 = vpack.c.bf16 %v74_v33, %v74_v33  ;;  %v1795_v35 = vpack.i.b16 %v77_v61, %v77_v61 }
 0x384   :  { %v1221_v63 = vpack.i.bf16 %v1220_v54, %v1220_v54  ;;  %v1453_v2 = vunpack.c.l.b16 %v1211_v57 }
 0x385   :  { %2290 = vmatpush3.bf16.msra.mxu0 %v2527_v23  ;;  %v1802_v39 = vpack.i.b16 %v78_v34, %v78_v34  ;;  %v1800_v30 = vrot.slane %v1795_v35, %v3052_v7 }
 0x386   :  { %v1454_v58 = vunpack.c.l.b16 %v1221_v63  ;;  %v1461_v13 = vsel %vm1298_vm9, %v1453_v2, %v1460_v8  ;;  %v82_v63 = vpack.c.bf16 %v81_v12, %v81_v12  ;;  %v2241_v8 = vld [vmem:[%s3222_s10] ss:$0 sm:$0xff] }
 0x387   :  { %v1469_v53 = vpack.c.b16 %v1461_v13, %v1461_v13  ;;  %v1807_v6 = vrot.slane %v1802_v39, %v3052_v7  ;;  %v2534_v7 = vld [vmem:[%s3221_s9 + $0x8] sm:$0xff]  }
 0x388   :  { %v1468_v14 = vsel %vm1298_vm9, %v1454_v58, %v1467_v9 }
 0x389   :  { %v1470_v62 = vpack.c.b16 %v1468_v14, %v1468_v14 }
 0x38b   :  { %1665 = vmatprep.mubr.bf16.mxu1 %v1470_v62  ;;  %v83_v62 = vld [vmem:[%s3215_s11 + $0x7] ss:$0 sm:$0xff] }
 0x38c   :  { %1666 = vmatmul.mubr.bf16.vlgmr.msra.gmra.mxu1 %v1469_v53 }
 0x38d   :  { %2373 = vmatpush3.bf16.msra.mxu1 %v2528_v4  ;;  %2388 = vmatprep.mubr.msk.bf16.mxu1 %vm2538_vm10, %v2537_v28 }
 0x38e   :  { %2374 = vmatprep.subr.bf16.mxu1 %v2537_v28 }
 0x391   :  { %2375 = vmatpush3.bf16.msra.mxu1 %v2529_v11 }
 0x392   :  { %2376 = vmatprep.subr.bf16.mxu1 %v2537_v28 }
 0x395   :  { %2377 = vmatpush3.bf16.msra.mxu1 %v2530_v25 }
 0x396   :  { %2378 = vmatprep.subr.bf16.mxu1 %v2537_v28 }
 0x399   :  { %2379 = vmatpush3.bf16.msra.mxu1 %v2531_v16 }
 0x39a   :  { %2380 = vmatprep.subr.bf16.mxu1 %v2537_v28 }
 0x39d   :  { %2381 = vmatpush3.bf16.msra.mxu1 %v2532_v32 }
 0x39e   :  { %2382 = vmatprep.subr.bf16.mxu1 %v2537_v28 }
 0x44c   :  { %v1667_v31 = vpop.f32.mrf.mxu1 }
 0x44d   :  { %v1668_v36 = vadd.f32 %v1667_v31, %v3092_v15 }
 0x44e   :  { %v1669_v41 = vpop.f32.mrf.mxu1 }
 0x44f   :  { %v1790_v38 = vadd.f32 %v3112_v37, %v1668_v36  ;;  %v1670_v40 = vadd.f32 %v1669_v41, %v3095_v27  ;;  %v2533_v27 = vld [vmem:[%s3221_s9 + $0x10] sm:$0xff]   ;;  %v2535_v37 = vld [vmem:[%s3221_s9] sm:$0xff]  }
 0x450   :  { %v1671_v43 = vpop.f32.mrf.mxu1  ;;  %2383 = vmatpush3.bf16.msra.mxu1 %v2533_v27 }
 0x451   :  { %v1792_v17 = vpack.c.bf16 %v1790_v38, %v1790_v38  ;;  %v1791_v42 = vadd.f32 %v3115_v46, %v1670_v40  ;;  %2384 = vmatprep.subr.bf16.mxu1 %v2537_v28 }
 0x452   :  { %v1672_v10 = vpop.f32.mrf.mxu1 }
 0x453   :  { %v1793_v60 = vpack.c.bf16 %v1791_v42, %v1791_v42  ;;  %v1808_v44 = vadd.bf16 %v1800_v30, %v1792_v17 }
 0x454   :  { %2385 = vmatpush3.bf16.msra.mxu1 %v2534_v7 }
 0x455   :  { %v1809_v47 = vadd.bf16 %v1807_v6, %v1793_v60  ;;  %v1810_v24 = vmax.bf16 %v2536_v45, %v1808_v44  ;;  %2386 = vmatprep.subr.bf16.mxu1 %v2537_v28 }
 0x457   :  { %v1811_v15 = vmax.bf16 %v2536_v45, %v1809_v47 }
 0x458   :  { %2387 = vmatpush3.bf16.msra.mxu1 %v2535_v37 }
 0x459   :  { %1972 = vmatprep.mubr.bf16.mxu0 %v1811_v15 }
 0x45a   :  { %1973 = vmatmul.mubr.bf16.vlgmr.msra.gmra.mxu0 %v1810_v24 }
 0x51a   :  { %v2291_v46 = vpop.f32.mrf.mxu0 }
 0x51c   :  { %v2292_v50 = vpop.f32.mrf.mxu0 }
 0x51d   :  { %v2293_v52 = vadd.f32 %v2292_v50, %v2291_v46 }
 0x51e   :  { %v2294_v54 = vpop.f32.mrf.mxu0 }
 0x51f   :  { %v1980_v55 = vpack.c.bf16 %v2293_v52, %v2293_v52 }
 0x520   :  { %v2295_v56 = vpop.f32.mrf.mxu0 }
 0x521   :  { %v1981_v57 = vadd.bf16 %v1980_v55, %v80_v51 }
 0x523   :  { %v1982_v59 = vmax.bf16 %v2536_v45, %v1981_v57 }
 0x525   :  { %2389 = vmatmul.mubr.bf16.vlgmr.msra.gmra.mxu1 %v1982_v59 }
 0x5e5   :  { %v2081_v0 = vpop.f32.mrf.mxu1 }
 0x5e6   :  { %v2087_v1 = vpack.c.bf16 %v2081_v0, %v2081_v0 }
 0x5e7   :  { %v2390_v2 = vpop.f32.mrf.mxu1 }
 0x5e8   :  { %v2088_v3 = vadd.bf16 %v2087_v1, %v82_v63 }
 0x5e9   :  { %v2084_v49 = vpop.f32.mrf.mxu1 }
 0x5ea   :  { %v2089_v58 = vmax.bf16 %v2536_v45, %v2088_v3 }
 0x5eb   :  { %v2391_v26 = vpop.f32.mrf.mxu1 }
 0x5ec   :  { %v2090_v9 = vunpack.c.l.bf16 %v2089_v58 }
 0x5ee   :  { %v2098_v13 = vmul.f32 %v2241_v8, %v2090_v9 }
 0x5f0   :  { %v2100_v14 = vsel %vm2099_vm11, %v2098_v13, 0.0 }
 0x5f1   :  { %2101 = vadd.xlane.f32.xlu0 %v2100_v14 }
 0x67a   :  { %v2102_v53 = vpop.xlane.xlu0 %2101 }
 0x67b   :  { %v2103_v20 = vadd.f32 %v2102_v53, %v83_v62 }
 0x67d   :  { %2105 = vst.msk [vmem:[%s3223_s12] sm:$0xff] %vm2104_vm12, %v2103_v20 }

</bundles_post_ra>
